<compile_context>
chip_gen: v7x
topology: tpu7x:2x2x1
jax: 0.10.0
libtpu: 0.0.40
codegen_flags: <defaults>
</compile_context>

<pallas_src>
import functools
import math

import jax
import jax.numpy as jnp
from jax.experimental import pallas as pl
from jax.experimental.pallas import tpu as pltpu


# ----------------------------- LayerNorm (exact) -----------------------------

def _layernorm(v, a, b, eps=1e-6):
    """Annotated-Transformer LayerNorm (Bessel std, eps added to std). Exact."""
    d = v.shape[-1]
    mean = jnp.mean(v, axis=-1, keepdims=True)
    c = v - mean
    var = jnp.sum(c * c, axis=-1, keepdims=True) * (1.0 / (d - 1))
    std = jnp.sqrt(var)
    return a * c / (std + eps) + b


# --------------------------------- the kernel --------------------------------

def decoder_layer_kernel(x_ref, m_ref, mask_ref,
                         wq_ref, wkv_ref, wo_ref, bq_ref, bkv_ref, bo_ref,
                         ln_a_ref, ln_b_ref,
                         w1_ref, b1_ref, w2_ref, b2_ref,
                         o_ref,
                         acc_ref, ln2_ref, k_cache_ref, v_cache_ref,
                         *, n_heads):
    qi = pl.program_id(1)                      # query-block axis ("arbitrary")
    f = pl.program_id(2)                       # d_ff-chunk axis ("arbitrary", innermost)

    D = x_ref.shape[-1]
    S = m_ref.shape[1]
    H = n_heads
    dk = D // H
    scale = 1.0 / math.sqrt(dk)

    # ---- K/V projection: once per batch.  Correct because the qi axis is
    #      "arbitrary" (never megacore-sharded), so every core that handles a
    #      batch sees its (qi==0, f==0) step before any other step of that batch.
    @pl.when((qi == 0) & (f == 0))
    def _fill_kv_cache():
        mem = m_ref[0]                                                     # (S, D) bf16
        kv = jnp.dot(mem, wkv_ref[...],
                     preferred_element_type=jnp.float32) + bkv_ref[...]    # (S, 2D) f32
        k3 = kv[:, :D].reshape(S, H, dk).astype(jnp.bfloat16)
        v3 = kv[:, D:].reshape(S, H, dk).astype(jnp.bfloat16)
        k_cache_ref[...] = pltpu.einshape("shd->hsd", k3)                  # (H, S, dk)
        v_cache_ref[...] = pltpu.einshape("shd->hsd", v3)                  # (H, S, dk)

    # ---- f == 0: src-attention sublayer (pre-LN + residual), init FFN accumulator.
    @pl.when(f == 0)
    def _attention():
        x = x_ref[0].astype(jnp.float32)                                   # (tq, D)
        tq = x.shape[0]

        ln_x = _layernorm(x, ln_a_ref[0], ln_b_ref[0])

        # Q projection: bf16 MXU operands, f32 accumulation.
        q = jnp.dot(ln_x.astype(jnp.bfloat16), wq_ref[...],
                    preferred_element_type=jnp.float32) + bq_ref[...]      # (tq, D)
        q = q * scale

        # Head-major layout via a single reshape + einshape relayout (no per-head
        # slices / stack).  Padded query rows (T % tq != 0) stay in their own rows
        # through LN / softmax / matmuls and are masked out at writeback.
        qh = pltpu.einshape("qhd->hqd",
                            q.reshape(tq, H, dk).astype(jnp.bfloat16))     # (H, tq, dk)

        # Additive mask bias computed once (not per head).
        mask_bias = jnp.where(mask_ref[0] == 0.0, -1e9, 0.0).astype(jnp.float32)  # (1, S)

        s = jnp.einsum('hqd,hkd->hqk', qh, k_cache_ref[...],
                       preferred_element_type=jnp.float32)                 # (H, tq, S)
        s = s + mask_bias[None]
        s = s - jnp.max(s, axis=-1, keepdims=True)
        p = jnp.exp(s)
        p = p * pl.reciprocal(jnp.sum(p, axis=-1, keepdims=True), approx=True)

        ctx = jnp.einsum('hqk,hkd->hqd', p.astype(jnp.bfloat16), v_cache_ref[...],
                         preferred_element_type=jnp.float32)               # (H, tq, dk)
        attn = pltpu.einshape("hqd->qhd", ctx).reshape(tq, D)              # (tq, D)
        attn_out = jnp.dot(attn.astype(jnp.bfloat16), wo_ref[...],
                           preferred_element_type=jnp.float32) + bo_ref[...]

        x2 = x + attn_out                      # residual (dropout == identity)

        # Initialize the FFN accumulator (fold output bias b2 in once) and cache
        # the second LayerNorm for all d_ff chunks.
        acc_ref[...] = x2 + b2_ref[...]
        ln2_ref[...] = _layernorm(x2, ln_a_ref[1], ln_b_ref[1]).astype(jnp.bfloat16)

    # ---- every f: one d_ff chunk of the feed-forward, accumulated into acc.
    h1 = jnp.maximum(
        jnp.dot(ln2_ref[...], w1_ref[...], preferred_element_type=jnp.float32)
        + b1_ref[...], 0.0)                                                # (tq, tdff)
    acc_ref[...] += jnp.dot(h1.astype(jnp.bfloat16), w2_ref[...],
                            preferred_element_type=jnp.float32)            # (tq, D)

    @pl.when(f == pl.num_programs(2) - 1)
    def _finalize():
        o_ref[0] = acc_ref[...].astype(o_ref.dtype)


# -------------------------------- tiling helpers --------------------------------

def _pick_tdff(D, d_ff):
    # Whole FFN resident (W1/W2 DMA'd once for the entire call) when the bf16
    # weights, double-buffered, stay under ~16 MiB.
    if 8 * D * d_ff <= 16 * 2 ** 20:
        return d_ff
    # Otherwise stream d_ff in the largest chunk that is a multiple of 128,
    # divides d_ff, and is <= 1024 (bounds VMEM on v7x's 64 MiB).
    for cand in range(1024, 0, -128):
        if d_ff % cand == 0:
            return cand
    # TODO(synk): pad d_ff to a multiple of 128 instead of holding W1/W2 fully
    #             resident when d_ff has no suitable divisor.
    return d_ff


def _pick_tq(T):
    if T % 256 == 0:
        return 256      # fills the 256-wide MXU M dim on v6e/v7x; harmless on v5e
    if T % 128 == 0:
        return 128
    return min(T, 128)


# --------------------------------- the wrapper --------------------------------

def decoder_layer(x, memory, src_mask, params, *, n_heads):
    B, T, D = x.shape
    S = memory.shape[1]
    d_ff = params["w1"].shape[-1]
    assert D % n_heads == 0
    dk = D // n_heads

    wdt = jnp.bfloat16
    # Pre-pack / pre-cast weights (plain JAX, outside the kernel).
    wq = params["wq"].astype(wdt)                                           # (D, D)
    wkv = jnp.concatenate([params["wk"], params["wv"]], axis=-1).astype(wdt)  # (D, 2D)
    wo = params["wo"].astype(wdt)                                           # (D, D)
    w1 = params["w1"].astype(wdt)                                           # (D, d_ff)
    w2 = params["w2"].astype(wdt)                                           # (d_ff, D)
    bq = params["bq"].reshape(1, D).astype(jnp.float32)
    bkv = jnp.concatenate([params["bk"], params["bv"]],
                          axis=-1).reshape(1, 2 * D).astype(jnp.float32)
    bo = params["bo"].reshape(1, D).astype(jnp.float32)
    b1 = params["b1"].reshape(1, d_ff).astype(jnp.float32)
    b2 = params["b2"].reshape(1, D).astype(jnp.float32)
    ln_a = jnp.stack([params["ln1_a"], params["ln2_a"]]).reshape(2, 1, D).astype(jnp.float32)
    ln_b = jnp.stack([params["ln1_b"], params["ln2_b"]]).reshape(2, 1, D).astype(jnp.float32)

    # `memory` is only ever an MXU operand -> ship it to the kernel in bf16.
    mem_bf16 = memory.astype(jnp.bfloat16)
    mask_f32 = src_mask.astype(jnp.float32)

    tq = _pick_tq(T)
    tdff = _pick_tdff(D, d_ff)
    nq = pl.cdiv(T, tq)
    nf = d_ff // tdff

    kernel = functools.partial(decoder_layer_kernel, n_heads=n_heads)

    grid_spec = pltpu.PrefetchScalarGridSpec(
        num_scalar_prefetch=0,
        grid=(B, nq, nf),
        in_specs=[
            pl.BlockSpec((1, tq, D), lambda b, qi, f: (b, qi, 0)),    # x
            pl.BlockSpec((1, S, D), lambda b, qi, f: (b, 0, 0)),      # memory (bf16)
            pl.BlockSpec((1, 1, S), lambda b, qi, f: (b, 0, 0)),      # src_mask
            pl.BlockSpec((D, D), lambda b, qi, f: (0, 0)),            # Wq (bf16)
            pl.BlockSpec((D, 2 * D), lambda b, qi, f: (0, 0)),        # W[k|v] packed (bf16)
            pl.BlockSpec((D, D), lambda b, qi, f: (0, 0)),            # Wo (bf16)
            pl.BlockSpec((1, D), lambda b, qi, f: (0, 0)),            # bq
            pl.BlockSpec((1, 2 * D), lambda b, qi, f: (0, 0)),        # b[k|v]
            pl.BlockSpec((1, D), lambda b, qi, f: (0, 0)),            # bo
            pl.BlockSpec((2, 1, D), lambda b, qi, f: (0, 0, 0)),      # LN scales
            pl.BlockSpec((2, 1, D), lambda b, qi, f: (0, 0, 0)),      # LN biases
            pl.BlockSpec((D, tdff), lambda b, qi, f: (0, f)),         # W1 chunk (bf16)
            pl.BlockSpec((1, tdff), lambda b, qi, f: (0, f)),         # b1 chunk
            pl.BlockSpec((tdff, D), lambda b, qi, f: (f, 0)),         # W2 chunk (bf16)
            pl.BlockSpec((1, D), lambda b, qi, f: (0, 0)),            # b2
        ],
        out_specs=pl.BlockSpec((1, tq, D), lambda b, qi, f: (b, qi, 0)),
        scratch_shapes=[
            pltpu.VMEM((tq, D), jnp.float32),                 # residual + FFN accumulator
            pltpu.VMEM((tq, D), jnp.bfloat16),                # LayerNorm_2(x2), reused per f
            pltpu.VMEM((n_heads, S, dk), jnp.bfloat16),       # K cache (per batch)
            pltpu.VMEM((n_heads, S, dk), jnp.bfloat16),       # V cache (per batch)
        ],
    )

    # ----- advisory cost estimate (accounts for FFN weight re-streaming if nf>1) -----
    flops = int(B * (4 * T * D * D            # Q + output projections
                     + 4 * S * D * D          # packed K/V projection (once per batch)
                     + 4 * T * S * D          # scores + context
                     + 4 * T * D * d_ff))     # FFN
    transcendentals = int(B * n_heads * T * S + 4 * B * T)
    ffn_restream = (B * nq) if nf > 1 else 1
    bytes_w = 2 * (wq.size + wkv.size + wo.size) + 2 * (w1.size + w2.size) * ffn_restream
    bytes_b = 4 * (bq.size + bkv.size + bo.size + b2.size + ln_a.size + ln_b.size) \
        + 4 * b1.size * ffn_restream
    bytes_act = 4 * x.size + 2 * mem_bf16.size + 4 * mask_f32.size + 4 * B * T * D
    cost = pl.CostEstimate(flops=flops, transcendentals=transcendentals,
                           bytes_accessed=int(bytes_w + bytes_b + bytes_act))

    # ----- generation-aware VMEM budget: explicit double-buffer accounting, capped
    #       at 75% of physical VMEM (48 MiB on v7x, ~96 MiB on v5e/v6e). -----
    try:
        vmem_cap = int(pltpu.get_tpu_info().vmem_capacity_bytes)
    except Exception:
        vmem_cap = 64 * 2 ** 20    # conservative fallback (v7x per-TensorCore)
    db = 2                                                        # pipeline double-buffering
    cache_minor = ((dk + 127) // 128) * 128                       # lane padding of K/V caches
    bytes_attn_w = db * 2 * (D * D + D * 2 * D + D * D)           # Wq/Wkv/Wo blocks (bf16)
    bytes_ffn_w = db * 2 * (D * tdff + tdff * D)                  # W1/W2 chunks (bf16)
    bytes_vec = db * 4 * (D + 2 * D + D + tdff + D + 4 * D)       # biases + LN params (f32)
    bytes_io = db * (4 * tq * D + 4 * tq * D + 2 * S * D + 4 * S)  # x/out f32, memory bf16, mask
    bytes_scr = 4 * tq * D + 2 * tq * D + 2 * 2 * n_heads * S * cache_minor
    bytes_tmp = 4 * (S * 2 * D + 2 * n_heads * tq * S + tq * tdff + 6 * tq * D)
    resident = bytes_attn_w + bytes_ffn_w + bytes_vec + bytes_io + bytes_scr + bytes_tmp
    vmem_limit = int(min(0.75 * vmem_cap, max(32 * 2 ** 20, 1.5 * resident)))

    return pl.pallas_call(
        kernel,
        out_shape=jax.ShapeDtypeStruct((B, T, D), x.dtype),
        grid_spec=grid_spec,
        compiler_params=pltpu.CompilerParams(
            # qi is "arbitrary" (not megacore-sharded) so the per-batch K/V cache
            # gate on qi==0 is correct; batch axis carries the megacore parallelism.
            dimension_semantics=("parallel", "arbitrary", "arbitrary"),
            vmem_limit_bytes=vmem_limit),
        cost_estimate=cost,
    )(x, mem_bf16, mask_f32, wq, wkv, wo, bq, bkv, bo, ln_a, ln_b, w1, b1, w2, b2)


# ------------------------------ pure-JAX reference ------------------------------

def decoder_layer_ref(x, memory, src_mask, params, *, n_heads):
    B, T, D = x.shape
    S = memory.shape[1]
    dk = D // n_heads

    ln1 = _layernorm(x, params["ln1_a"], params["ln1_b"])
    q = ln1 @ params["wq"] + params["bq"]
    k = memory @ params["wk"] + params["bk"]
    v = memory @ params["wv"] + params["bv"]
    qh = q.reshape(B, T, n_heads, dk).transpose(0, 2, 1, 3)
    kh = k.reshape(B, S, n_heads, dk).transpose(0, 2, 1, 3)
    vh = v.reshape(B, S, n_heads, dk).transpose(0, 2, 1, 3)
    sc = jnp.einsum('bhtd,bhsd->bhts', qh, kh) / math.sqrt(dk)
    sc = jnp.where(src_mask[:, None, :, :] == 0.0, -1e9, sc)
    p = jax.nn.softmax(sc, axis=-1)
    ctx = jnp.einsum('bhts,bhsd->bhtd', p, vh).transpose(0, 2, 1, 3).reshape(B, T, D)
    attn = ctx @ params["wo"] + params["bo"]
    x2 = x + attn
    ln2 = _layernorm(x2, params["ln2_a"], params["ln2_b"])
    ff = jnp.maximum(ln2 @ params["w1"] + params["b1"], 0.0) @ params["w2"] + params["b2"]
    return x2 + ff


# ------------------------------------ main ------------------------------------

if __name__ == "__main__":
    B, T, S, D, H, DFF = 2, 8, 8, 32, 4, 64

    key = jax.random.PRNGKey(0)
    ks = jax.random.split(key, 16)
    x = jax.random.normal(ks[0], (B, T, D), jnp.float32)
    memory = jax.random.normal(ks[1], (B, S, D), jnp.float32)

    # src_mask: batch 0 all valid; batch 1 masks the last two source positions.
    src_mask = jnp.ones((B, 1, S), jnp.float32).at[1, 0, -2:].set(0.0)

    def w(k, shape):
        return 0.05 * jax.random.normal(k, shape, jnp.float32)

    params = {
        "wq": w(ks[2], (D, D)), "wk": w(ks[3], (D, D)),
        "wv": w(ks[4], (D, D)), "wo": w(ks[5], (D, D)),
        "bq": w(ks[6], (D,)), "bk": w(ks[7], (D,)),
        "bv": w(ks[8], (D,)), "bo": w(ks[9], (D,)),
        "w1": w(ks[10], (D, DFF)), "b1": w(ks[11], (DFF,)),
        "w2": w(ks[12], (DFF, D)), "b2": w(ks[13], (D,)),
        # LayerNorm params initialized like nn.Parameter(ones / zeros).
        "ln1_a": jnp.ones((D,), jnp.float32), "ln1_b": jnp.zeros((D,), jnp.float32),
        "ln2_a": jnp.ones((D,), jnp.float32), "ln2_b": jnp.zeros((D,), jnp.float32),
    }

    out = jax.block_until_ready(decoder_layer(x, memory, src_mask, params, n_heads=H))
    ref = decoder_layer_ref(x, memory, src_mask, params, n_heads=H)

    assert out.shape == (B, T, D)
    # bf16 MXU operands (f32 accumulation) + approx softmax reciprocal; LayerNorm
    # now uses exact division, so the tolerance is back near matmul-rounding level.
    err = float(jnp.max(jnp.abs(out.astype(jnp.float32) - ref)))
    assert err < 5e-3, f"mismatch vs reference: {err}"

    print("KERNEL_OK")
</pallas_src>

<mosaic_0001>
module attributes {stable_mosaic.version = 11 : i64} {
  func.func @decoder_layer_kernel(%arg0: i32, %arg1: i32, %arg2: i32, %arg3: memref<1x8x32xf32, #tpu.memory_space<vmem>>, %arg4: memref<1x8x32xbf16, #tpu.memory_space<vmem>>, %arg5: memref<1x1x8xf32, #tpu.memory_space<vmem>>, %arg6: memref<32x32xbf16, #tpu.memory_space<vmem>>, %arg7: memref<32x64xbf16, #tpu.memory_space<vmem>>, %arg8: memref<32x32xbf16, #tpu.memory_space<vmem>>, %arg9: memref<1x32xf32, #tpu.memory_space<vmem>>, %arg10: memref<1x64xf32, #tpu.memory_space<vmem>>, %arg11: memref<1x32xf32, #tpu.memory_space<vmem>>, %arg12: memref<2x1x32xf32, #tpu.memory_space<vmem>>, %arg13: memref<2x1x32xf32, #tpu.memory_space<vmem>>, %arg14: memref<32x64xbf16, #tpu.memory_space<vmem>>, %arg15: memref<1x64xf32, #tpu.memory_space<vmem>>, %arg16: memref<64x32xbf16, #tpu.memory_space<vmem>>, %arg17: memref<1x32xf32, #tpu.memory_space<vmem>>, %arg18: memref<1x8x32xf32, #tpu.memory_space<vmem>>, %arg19: memref<8x32xf32, #tpu.memory_space<vmem>>, %arg20: memref<8x32xbf16, #tpu.memory_space<vmem>>, %arg21: memref<4x8x8xbf16, #tpu.memory_space<vmem>>, %arg22: memref<4x8x8xbf16, #tpu.memory_space<vmem>>) attributes {dimension_semantics = [#tpu.dimension_semantics<parallel>, #tpu.dimension_semantics<arbitrary>, #tpu.dimension_semantics<arbitrary>], iteration_bounds = array<i64: 2, 1, 1>, scalar_prefetch = 0 : i64, scratch_operands = 4 : i64, tpu.core_type = #tpu.core_type<tc>, window_params = [{transform_indices = @transform_0, window_bounds = array<i64: 1, 8, 32>}, {transform_indices = @transform_1, window_bounds = array<i64: 1, 8, 32>}, {transform_indices = @transform_2, window_bounds = array<i64: 1, 1, 8>}, {pipeline_mode = #tpu.pipeline_mode<synchronous>, transform_indices = @transform_3, window_bounds = array<i64: 32, 32>}, {pipeline_mode = #tpu.pipeline_mode<synchronous>, transform_indices = @transform_4, window_bounds = array<i64: 32, 64>}, {pipeline_mode = #tpu.pipeline_mode<synchronous>, transform_indices = @transform_5, window_bounds = array<i64: 32, 32>}, {pipeline_mode = #tpu.pipeline_mode<synchronous>, transform_indices = @transform_6, window_bounds = array<i64: 1, 32>}, {pipeline_mode = #tpu.pipeline_mode<synchronous>, transform_indices = @transform_7, window_bounds = array<i64: 1, 64>}, {pipeline_mode = #tpu.pipeline_mode<synchronous>, transform_indices = @transform_8, window_bounds = array<i64: 1, 32>}, {pipeline_mode = #tpu.pipeline_mode<synchronous>, transform_indices = @transform_9, window_bounds = array<i64: 2, 1, 32>}, {pipeline_mode = #tpu.pipeline_mode<synchronous>, transform_indices = @transform_10, window_bounds = array<i64: 2, 1, 32>}, {transform_indices = @transform_11, window_bounds = array<i64: 32, 64>}, {transform_indices = @transform_12, window_bounds = array<i64: 1, 64>}, {transform_indices = @transform_13, window_bounds = array<i64: 64, 32>}, {pipeline_mode = #tpu.pipeline_mode<synchronous>, transform_indices = @transform_14, window_bounds = array<i64: 1, 32>}, {transform_indices = @transform_15, window_bounds = array<i64: 1, 8, 32>}]} {
    %c0_i32 = arith.constant 0 : i32
    %0 = arith.cmpi eq, %arg1, %c0_i32 : i32
    %c0_i32_0 = arith.constant 0 : i32
    %1 = arith.cmpi eq, %arg2, %c0_i32_0 : i32
    %2 = arith.andi %0, %1 : i1
    %3 = arith.extui %2 : i1 to i32
    %c0_i32_1 = arith.constant 0 : i32
    %4 = arith.cmpi ne, %3, %c0_i32_1 : i32
    scf.if %4 {
      %c0_19 = arith.constant 0 : index
      %c0_20 = arith.constant 0 : index
      %c0_21 = arith.constant 0 : index
      %25 = vector.load %arg4[%c0_19, %c0_20, %c0_21] : memref<1x8x32xbf16, #tpu.memory_space<vmem>>, vector<1x8x32xbf16>
      %26 = vector.shape_cast %25 : vector<1x8x32xbf16> to vector<8x32xbf16>
      %c0_22 = arith.constant 0 : index
      %c0_23 = arith.constant 0 : index
      %27 = vector.load %arg7[%c0_22, %c0_23] : memref<32x64xbf16, #tpu.memory_space<vmem>>, vector<32x64xbf16>
      %cst_24 = arith.constant dense<0.000000e+00> : vector<8x64xf32>
      %28 = tpu.matmul %26, %27, %cst_24 {dimension_numbers = #tpu.dot_dimension_numbers<[1], [0], [0], [1], [0, 0, 1, 1], [], []>} : vector<8x32xbf16>, vector<32x64xbf16>, vector<8x64xf32> -> vector<8x64xf32>
      %c0_25 = arith.constant 0 : index
      %c0_26 = arith.constant 0 : index
      %29 = vector.load %arg10[%c0_25, %c0_26] : memref<1x64xf32, #tpu.memory_space<vmem>>, vector<1x64xf32>
      %30 = vector.broadcast %29 : vector<1x64xf32> to vector<8x64xf32>
      %31 = arith.addf %28, %30 : vector<8x64xf32>
      %32 = vector.extract_strided_slice %31 {offsets = [0, 0], sizes = [8, 32], strides = [1, 1]} : vector<8x64xf32> to vector<8x32xf32>
      %33 = vector.shape_cast %32 : vector<8x32xf32> to vector<8x4x8xf32>
      %34 = arith.truncf %33 : vector<8x4x8xf32> to vector<8x4x8xbf16>
      %35 = vector.extract_strided_slice %31 {offsets = [0, 32], sizes = [8, 32], strides = [1, 1]} : vector<8x64xf32> to vector<8x32xf32>
      %36 = vector.shape_cast %35 : vector<8x32xf32> to vector<8x4x8xf32>
      %37 = arith.truncf %36 : vector<8x4x8xf32> to vector<8x4x8xbf16>
      %38 = tpu.transpose %34, [1, 0, 2] : vector<8x4x8xbf16> -> vector<4x8x8xbf16>
      %c0_27 = arith.constant 0 : index
      %c0_28 = arith.constant 0 : index
      %c0_29 = arith.constant 0 : index
      %39 = vector.load %arg21[%c0_27, %c0_28, %c0_29] : memref<4x8x8xbf16, #tpu.memory_space<vmem>>, vector<4x8x8xbf16>
      tpu.vector_store %arg21[%c0_27, %c0_28, %c0_29], %38 {strides = array<i32>} : memref<4x8x8xbf16, #tpu.memory_space<vmem>>, vector<4x8x8xbf16>,
      %40 = tpu.transpose %37, [1, 0, 2] : vector<8x4x8xbf16> -> vector<4x8x8xbf16>
      %c0_30 = arith.constant 0 : index
      %c0_31 = arith.constant 0 : index
      %c0_32 = arith.constant 0 : index
      %41 = vector.load %arg22[%c0_30, %c0_31, %c0_32] : memref<4x8x8xbf16, #tpu.memory_space<vmem>>, vector<4x8x8xbf16>
      tpu.vector_store %arg22[%c0_30, %c0_31, %c0_32], %40 {strides = array<i32>} : memref<4x8x8xbf16, #tpu.memory_space<vmem>>, vector<4x8x8xbf16>,
    } else {
    }
    %c0_i32_2 = arith.constant 0 : i32
    %5 = arith.cmpi eq, %arg2, %c0_i32_2 : i32
    %6 = arith.extui %5 : i1 to i32
    %c0_i32_3 = arith.constant 0 : i32
    %7 = arith.cmpi ne, %6, %c0_i32_3 : i32
    scf.if %7 {
      %c0_19 = arith.constant 0 : index
      %c0_20 = arith.constant 0 : index
      %c0_21 = arith.constant 0 : index
      %25 = vector.load %arg3[%c0_19, %c0_20, %c0_21] : memref<1x8x32xf32, #tpu.memory_space<vmem>>, vector<1x8x32xf32>
      %26 = vector.shape_cast %25 : vector<1x8x32xf32> to vector<8x32xf32>
      %c0_22 = arith.constant 0 : index
      %c0_23 = arith.constant 0 : index
      %c0_24 = arith.constant 0 : index
      %27 = vector.load %arg12[%c0_22, %c0_23, %c0_24] : memref<2x1x32xf32, #tpu.memory_space<vmem>>, vector<1x1x32xf32>
      %28 = vector.shape_cast %27 : vector<1x1x32xf32> to vector<1x32xf32>
      %c0_25 = arith.constant 0 : index
      %c0_26 = arith.constant 0 : index
      %c0_27 = arith.constant 0 : index
      %29 = vector.load %arg13[%c0_25, %c0_26, %c0_27] : memref<2x1x32xf32, #tpu.memory_space<vmem>>, vector<1x1x32xf32>
      %30 = vector.shape_cast %29 : vector<1x1x32xf32> to vector<1x32xf32>
      %cst_28 = arith.constant dense<0.000000e+00> : vector<8xf32>
      %31 = vector.multi_reduction <add>, %26, %cst_28 [1] : vector<8x32xf32> to vector<8xf32>
      %32 = vector.shape_cast %31 : vector<8xf32> to vector<8x1xf32>
      %cst_29 = arith.constant 3.200000e+01 : f32
      %33 = vector.broadcast %cst_29 : f32 to vector<8x1xf32>
      %34 = arith.divf %32, %33 : vector<8x1xf32>
      %35 = vector.broadcast %34 : vector<8x1xf32> to vector<8x32xf32>
      %36 = arith.subf %26, %35 : vector<8x32xf32>
      %37 = arith.mulf %36, %36 : vector<8x32xf32>
      %cst_30 = arith.constant dense<0.000000e+00> : vector<8xf32>
      %38 = vector.multi_reduction <add>, %37, %cst_30 [1] : vector<8x32xf32> to vector<8xf32>
      %39 = vector.shape_cast %38 : vector<8xf32> to vector<8x1xf32>
      %cst_31 = arith.constant 0.0322580636 : f32
      %40 = vector.broadcast %cst_31 : f32 to vector<8x1xf32>
      %41 = arith.mulf %39, %40 : vector<8x1xf32>
      %42 = math.sqrt %41 : vector<8x1xf32>
      %43 = vector.broadcast %28 : vector<1x32xf32> to vector<8x32xf32>
      %44 = arith.mulf %43, %36 : vector<8x32xf32>
      %cst_32 = arith.constant 9.99999997E-7 : f32
      %45 = vector.broadcast %cst_32 : f32 to vector<8x1xf32>
      %46 = arith.addf %42, %45 : vector<8x1xf32>
      %47 = vector.broadcast %46 : vector<8x1xf32> to vector<8x32xf32>
      %48 = arith.divf %44, %47 : vector<8x32xf32>
      %49 = vector.broadcast %30 : vector<1x32xf32> to vector<8x32xf32>
      %50 = arith.addf %48, %49 : vector<8x32xf32>
      %51 = arith.truncf %50 : vector<8x32xf32> to vector<8x32xbf16>
      %c0_33 = arith.constant 0 : index
      %c0_34 = arith.constant 0 : index
      %52 = vector.load %arg6[%c0_33, %c0_34] : memref<32x32xbf16, #tpu.memory_space<vmem>>, vector<32x32xbf16>
      %cst_35 = arith.constant dense<0.000000e+00> : vector<8x32xf32>
      %53 = tpu.matmul %51, %52, %cst_35 {dimension_numbers = #tpu.dot_dimension_numbers<[1], [0], [0], [1], [0, 0, 1, 1], [], []>} : vector<8x32xbf16>, vector<32x32xbf16>, vector<8x32xf32> -> vector<8x32xf32>
      %c0_36 = arith.constant 0 : index
      %c0_37 = arith.constant 0 : index
      %54 = vector.load %arg9[%c0_36, %c0_37] : memref<1x32xf32, #tpu.memory_space<vmem>>, vector<1x32xf32>
      %55 = vector.broadcast %54 : vector<1x32xf32> to vector<8x32xf32>
      %56 = arith.addf %53, %55 : vector<8x32xf32>
      %cst_38 = arith.constant 0.353553385 : f32
      %57 = vector.broadcast %cst_38 : f32 to vector<8x32xf32>
      %58 = arith.mulf %56, %57 : vector<8x32xf32>
      %59 = vector.shape_cast %58 : vector<8x32xf32> to vector<8x4x8xf32>
      %60 = arith.truncf %59 : vector<8x4x8xf32> to vector<8x4x8xbf16>
      %61 = tpu.transpose %60, [1, 0, 2] : vector<8x4x8xbf16> -> vector<4x8x8xbf16>
      %c0_39 = arith.constant 0 : index
      %c0_40 = arith.constant 0 : index
      %c0_41 = arith.constant 0 : index
      %62 = vector.load %arg5[%c0_39, %c0_40, %c0_41] : memref<1x1x8xf32, #tpu.memory_space<vmem>>, vector<1x1x8xf32>
      %63 = vector.shape_cast %62 : vector<1x1x8xf32> to vector<1x8xf32>
      %cst_42 = arith.constant 0.000000e+00 : f32
      %64 = vector.broadcast %cst_42 : f32 to vector<1x8xf32>
      %65 = arith.cmpf oeq, %63, %64 : vector<1x8xf32>
      %cst_43 = arith.constant -1.000000e+09 : f32
      %cst_44 = arith.constant 0.000000e+00 : f32
      %66 = vector.broadcast %cst_43 : f32 to vector<1x8xf32>
      %67 = vector.broadcast %cst_44 : f32 to vector<1x8xf32>
      %68 = arith.select %65, %66, %67 : vector<1x8xi1>, vector<1x8xf32>
      %c0_45 = arith.constant 0 : index
      %c0_46 = arith.constant 0 : index
      %c0_47 = arith.constant 0 : index
      %69 = vector.load %arg21[%c0_45, %c0_46, %c0_47] : memref<4x8x8xbf16, #tpu.memory_space<vmem>>, vector<4x8x8xbf16>
      "tpu.trace_start"() <{level = 10 : i32, message = "hqd,hkd->hqk"}> : () -> ()
      %cst_48 = arith.constant dense<0.000000e+00> : vector<4x8x8xf32>
      %70 = tpu.matmul %61, %69, %cst_48 {dimension_numbers = #tpu.dot_dimension_numbers<[2], [2], [1], [1], [0, 0, 0, 1, 1, 1], [0], [0]>} : vector<4x8x8xbf16>, vector<4x8x8xbf16>, vector<4x8x8xf32> -> vector<4x8x8xf32>
      "tpu.trace_stop"() : () -> ()
      %71 = vector.shape_cast %68 : vector<1x8xf32> to vector<1x1x8xf32>
      %72 = vector.broadcast %71 : vector<1x1x8xf32> to vector<4x8x8xf32>
      %73 = arith.addf %70, %72 : vector<4x8x8xf32>
      %cst_49 = arith.constant dense<0xFF800000> : vector<4x8xf32>
      %74 = vector.multi_reduction <maximumf>, %73, %cst_49 [2] : vector<4x8x8xf32> to vector<4x8xf32>
      %75 = vector.shape_cast %74 : vector<4x8xf32> to vector<4x8x1xf32>
      %76 = vector.broadcast %75 : vector<4x8x1xf32> to vector<4x8x8xf32>
      %77 = arith.subf %73, %76 : vector<4x8x8xf32>
      %78 = math.exp %77 : vector<4x8x8xf32>
      %cst_50 = arith.constant dense<0.000000e+00> : vector<4x8xf32>
      %79 = vector.multi_reduction <add>, %78, %cst_50 [2] : vector<4x8x8xf32> to vector<4x8xf32>
      %80 = vector.shape_cast %79 : vector<4x8xf32> to vector<4x8x1xf32>
      %81 = tpu.reciprocal %80 {approx = true} : vector<4x8x1xf32> -> vector<4x8x1xf32>
      %82 = vector.broadcast %81 : vector<4x8x1xf32> to vector<4x8x8xf32>
      %83 = arith.mulf %78, %82 : vector<4x8x8xf32>
      %84 = arith.truncf %83 : vector<4x8x8xf32> to vector<4x8x8xbf16>
      %c0_51 = arith.constant 0 : index
      %c0_52 = arith.constant 0 : index
      %c0_53 = arith.constant 0 : index
      %85 = vector.load %arg22[%c0_51, %c0_52, %c0_53] : memref<4x8x8xbf16, #tpu.memory_space<vmem>>, vector<4x8x8xbf16>
      "tpu.trace_start"() <{level = 10 : i32, message = "hqk,hkd->hqd"}> : () -> ()
      %cst_54 = arith.constant dense<0.000000e+00> : vector<4x8x8xf32>
      %86 = tpu.matmul %84, %85, %cst_54 {dimension_numbers = #tpu.dot_dimension_numbers<[2], [1], [1], [2], [0, 0, 0, 1, 1, 2], [0], [0]>} : vector<4x8x8xbf16>, vector<4x8x8xbf16>, vector<4x8x8xf32> -> vector<4x8x8xf32>
      "tpu.trace_stop"() : () -> ()
      %87 = tpu.transpose %86, [1, 0, 2] : vector<4x8x8xf32> -> vector<8x4x8xf32>
      %88 = vector.shape_cast %87 : vector<8x4x8xf32> to vector<8x32xf32>
      %89 = arith.truncf %88 : vector<8x32xf32> to vector<8x32xbf16>
      %c0_55 = arith.constant 0 : index
      %c0_56 = arith.constant 0 : index
      %90 = vector.load %arg8[%c0_55, %c0_56] : memref<32x32xbf16, #tpu.memory_space<vmem>>, vector<32x32xbf16>
      %cst_57 = arith.constant dense<0.000000e+00> : vector<8x32xf32>
      %91 = tpu.matmul %89, %90, %cst_57 {dimension_numbers = #tpu.dot_dimension_numbers<[1], [0], [0], [1], [0, 0, 1, 1], [], []>} : vector<8x32xbf16>, vector<32x32xbf16>, vector<8x32xf32> -> vector<8x32xf32>
      %c0_58 = arith.constant 0 : index
      %c0_59 = arith.constant 0 : index
      %92 = vector.load %arg11[%c0_58, %c0_59] : memref<1x32xf32, #tpu.memory_space<vmem>>, vector<1x32xf32>
      %93 = vector.broadcast %92 : vector<1x32xf32> to vector<8x32xf32>
      %94 = arith.addf %91, %93 : vector<8x32xf32>
      %95 = arith.addf %26, %94 : vector<8x32xf32>
      %c0_60 = arith.constant 0 : index
      %c0_61 = arith.constant 0 : index
      %96 = vector.load %arg17[%c0_60, %c0_61] : memref<1x32xf32, #tpu.memory_space<vmem>>, vector<1x32xf32>
      %97 = vector.broadcast %96 : vector<1x32xf32> to vector<8x32xf32>
      %98 = arith.addf %95, %97 : vector<8x32xf32>
      %c0_62 = arith.constant 0 : index
      %c0_63 = arith.constant 0 : index
      %99 = vector.load %arg19[%c0_62, %c0_63] : memref<8x32xf32, #tpu.memory_space<vmem>>, vector<8x32xf32>
      tpu.vector_store %arg19[%c0_62, %c0_63], %98 {strides = array<i32>} : memref<8x32xf32, #tpu.memory_space<vmem>>, vector<8x32xf32>,
      %c1 = arith.constant 1 : index
      %c0_64 = arith.constant 0 : index
      %c0_65 = arith.constant 0 : index
      %100 = vector.load %arg12[%c1, %c0_64, %c0_65] : memref<2x1x32xf32, #tpu.memory_space<vmem>>, vector<1x1x32xf32>
      %101 = vector.shape_cast %100 : vector<1x1x32xf32> to vector<1x32xf32>
      %c1_66 = arith.constant 1 : index
      %c0_67 = arith.constant 0 : index
      %c0_68 = arith.constant 0 : index
      %102 = vector.load %arg13[%c1_66, %c0_67, %c0_68] : memref<2x1x32xf32, #tpu.memory_space<vmem>>, vector<1x1x32xf32>
      %103 = vector.shape_cast %102 : vector<1x1x32xf32> to vector<1x32xf32>
      %cst_69 = arith.constant dense<0.000000e+00> : vector<8xf32>
      %104 = vector.multi_reduction <add>, %95, %cst_69 [1] : vector<8x32xf32> to vector<8xf32>
      %105 = vector.shape_cast %104 : vector<8xf32> to vector<8x1xf32>
      %cst_70 = arith.constant 3.200000e+01 : f32
      %106 = vector.broadcast %cst_70 : f32 to vector<8x1xf32>
      %107 = arith.divf %105, %106 : vector<8x1xf32>
      %108 = vector.broadcast %107 : vector<8x1xf32> to vector<8x32xf32>
      %109 = arith.subf %95, %108 : vector<8x32xf32>
      %110 = arith.mulf %109, %109 : vector<8x32xf32>
      %cst_71 = arith.constant dense<0.000000e+00> : vector<8xf32>
      %111 = vector.multi_reduction <add>, %110, %cst_71 [1] : vector<8x32xf32> to vector<8xf32>
      %112 = vector.shape_cast %111 : vector<8xf32> to vector<8x1xf32>
      %cst_72 = arith.constant 0.0322580636 : f32
      %113 = vector.broadcast %cst_72 : f32 to vector<8x1xf32>
      %114 = arith.mulf %112, %113 : vector<8x1xf32>
      %115 = math.sqrt %114 : vector<8x1xf32>
      %116 = vector.broadcast %101 : vector<1x32xf32> to vector<8x32xf32>
      %117 = arith.mulf %116, %109 : vector<8x32xf32>
      %cst_73 = arith.constant 9.99999997E-7 : f32
      %118 = vector.broadcast %cst_73 : f32 to vector<8x1xf32>
      %119 = arith.addf %115, %118 : vector<8x1xf32>
      %120 = vector.broadcast %119 : vector<8x1xf32> to vector<8x32xf32>
      %121 = arith.divf %117, %120 : vector<8x32xf32>
      %122 = vector.broadcast %103 : vector<1x32xf32> to vector<8x32xf32>
      %123 = arith.addf %121, %122 : vector<8x32xf32>
      %124 = arith.truncf %123 : vector<8x32xf32> to vector<8x32xbf16>
      %c0_74 = arith.constant 0 : index
      %c0_75 = arith.constant 0 : index
      %125 = vector.load %arg20[%c0_74, %c0_75] : memref<8x32xbf16, #tpu.memory_space<vmem>>, vector<8x32xbf16>
      tpu.vector_store %arg20[%c0_74, %c0_75], %124 {strides = array<i32>} : memref<8x32xbf16, #tpu.memory_space<vmem>>, vector<8x32xbf16>,
    } else {
    }
    %c0 = arith.constant 0 : index
    %c0_4 = arith.constant 0 : index
    %8 = vector.load %arg20[%c0, %c0_4] : memref<8x32xbf16, #tpu.memory_space<vmem>>, vector<8x32xbf16>
    %c0_5 = arith.constant 0 : index
    %c0_6 = arith.constant 0 : index
    %9 = vector.load %arg14[%c0_5, %c0_6] : memref<32x64xbf16, #tpu.memory_space<vmem>>, vector<32x64xbf16>
    %cst = arith.constant dense<0.000000e+00> : vector<8x64xf32>
    %10 = tpu.matmul %8, %9, %cst {dimension_numbers = #tpu.dot_dimension_numbers<[1], [0], [0], [1], [0, 0, 1, 1], [], []>} : vector<8x32xbf16>, vector<32x64xbf16>, vector<8x64xf32> -> vector<8x64xf32>
    %c0_7 = arith.constant 0 : index
    %c0_8 = arith.constant 0 : index
    %11 = vector.load %arg15[%c0_7, %c0_8] : memref<1x64xf32, #tpu.memory_space<vmem>>, vector<1x64xf32>
    %12 = vector.broadcast %11 : vector<1x64xf32> to vector<8x64xf32>
    %13 = arith.addf %10, %12 : vector<8x64xf32>
    %cst_9 = arith.constant 0.000000e+00 : f32
    %14 = vector.broadcast %cst_9 : f32 to vector<8x64xf32>
    %15 = arith.maximumf %13, %14 : vector<8x64xf32>
    %c0_10 = arith.constant 0 : index
    %c0_11 = arith.constant 0 : index
    %16 = vector.load %arg19[%c0_10, %c0_11] : memref<8x32xf32, #tpu.memory_space<vmem>>, vector<8x32xf32>
    %17 = arith.truncf %15 : vector<8x64xf32> to vector<8x64xbf16>
    %c0_12 = arith.constant 0 : index
    %c0_13 = arith.constant 0 : index
    %18 = vector.load %arg16[%c0_12, %c0_13] : memref<64x32xbf16, #tpu.memory_space<vmem>>, vector<64x32xbf16>
    %cst_14 = arith.constant dense<0.000000e+00> : vector<8x32xf32>
    %19 = tpu.matmul %17, %18, %cst_14 {dimension_numbers = #tpu.dot_dimension_numbers<[1], [0], [0], [1], [0, 0, 1, 1], [], []>} : vector<8x64xbf16>, vector<64x32xbf16>, vector<8x32xf32> -> vector<8x32xf32>
    %20 = arith.addf %16, %19 : vector<8x32xf32>
    %c0_15 = arith.constant 0 : index
    %c0_16 = arith.constant 0 : index
    %21 = vector.load %arg19[%c0_15, %c0_16] : memref<8x32xf32, #tpu.memory_space<vmem>>, vector<8x32xf32>
    tpu.vector_store %arg19[%c0_15, %c0_16], %20 {strides = array<i32>} : memref<8x32xf32, #tpu.memory_space<vmem>>, vector<8x32xf32>,
    %c0_i32_17 = arith.constant 0 : i32
    %22 = arith.cmpi eq, %arg2, %c0_i32_17 : i32
    %23 = arith.extui %22 : i1 to i32
    %c0_i32_18 = arith.constant 0 : i32
    %24 = arith.cmpi ne, %23, %c0_i32_18 : i32
    scf.if %24 {
      %c0_19 = arith.constant 0 : index
      %c0_20 = arith.constant 0 : index
      %25 = vector.load %arg19[%c0_19, %c0_20] : memref<8x32xf32, #tpu.memory_space<vmem>>, vector<8x32xf32>
      %c0_21 = arith.constant 0 : index
      %c0_22 = arith.constant 0 : index
      %c0_23 = arith.constant 0 : index
      %26 = vector.load %arg18[%c0_21, %c0_22, %c0_23] : memref<1x8x32xf32, #tpu.memory_space<vmem>>, vector<1x8x32xf32>
      %27 = vector.shape_cast %26 : vector<1x8x32xf32> to vector<8x32xf32>
      %28 = vector.shape_cast %25 : vector<8x32xf32> to vector<1x8x32xf32>
      tpu.vector_store %arg18[%c0_21, %c0_22, %c0_23], %28 {strides = array<i32>} : memref<1x8x32xf32, #tpu.memory_space<vmem>>, vector<1x8x32xf32>,
    } else {
    }
    return
  }
  func.func @transform_0(%arg0: i32, %arg1: i32, %arg2: i32) -> (i32, i32, i32) {
    %c0_i32 = arith.constant 0 : i32
    %c0_i32_0 = arith.constant 0 : i32
    return %arg0, %arg1, %c0_i32 : i32, i32, i32
  }
  func.func @transform_1(%arg0: i32, %arg1: i32, %arg2: i32) -> (i32, i32, i32) {
    %c0_i32 = arith.constant 0 : i32
    %c0_i32_0 = arith.constant 0 : i32
    %c0_i32_1 = arith.constant 0 : i32
    return %arg0, %c0_i32, %c0_i32_0 : i32, i32, i32
  }
  func.func @transform_2(%arg0: i32, %arg1: i32, %arg2: i32) -> (i32, i32, i32) {
    %c0_i32 = arith.constant 0 : i32
    %c0_i32_0 = arith.constant 0 : i32
    %c0_i32_1 = arith.constant 0 : i32
    return %arg0, %c0_i32, %c0_i32_0 : i32, i32, i32
  }
  func.func @transform_3(%arg0: i32, %arg1: i32, %arg2: i32) -> (i32, i32) {
    %c0_i32 = arith.constant 0 : i32
    %c0_i32_0 = arith.constant 0 : i32
    %c0_i32_1 = arith.constant 0 : i32
    return %c0_i32, %c0_i32_0 : i32, i32
  }
  func.func @transform_4(%arg0: i32, %arg1: i32, %arg2: i32) -> (i32, i32) {
    %c0_i32 = arith.constant 0 : i32
    %c0_i32_0 = arith.constant 0 : i32
    %c0_i32_1 = arith.constant 0 : i32
    return %c0_i32, %c0_i32_0 : i32, i32
  }
  func.func @transform_5(%arg0: i32, %arg1: i32, %arg2: i32) -> (i32, i32) {
    %c0_i32 = arith.constant 0 : i32
    %c0_i32_0 = arith.constant 0 : i32
    %c0_i32_1 = arith.constant 0 : i32
    return %c0_i32, %c0_i32_0 : i32, i32
  }
  func.func @transform_6(%arg0: i32, %arg1: i32, %arg2: i32) -> (i32, i32) {
    %c0_i32 = arith.constant 0 : i32
    %c0_i32_0 = arith.constant 0 : i32
    %c0_i32_1 = arith.constant 0 : i32
    return %c0_i32, %c0_i32_0 : i32, i32
  }
  func.func @transform_7(%arg0: i32, %arg1: i32, %arg2: i32) -> (i32, i32) {
    %c0_i32 = arith.constant 0 : i32
    %c0_i32_0 = arith.constant 0 : i32
    %c0_i32_1 = arith.constant 0 : i32
    return %c0_i32, %c0_i32_0 : i32, i32
  }
  func.func @transform_8(%arg0: i32, %arg1: i32, %arg2: i32) -> (i32, i32) {
    %c0_i32 = arith.constant 0 : i32
    %c0_i32_0 = arith.constant 0 : i32
    %c0_i32_1 = arith.constant 0 : i32
    return %c0_i32, %c0_i32_0 : i32, i32
  }
  func.func @transform_9(%arg0: i32, %arg1: i32, %arg2: i32) -> (i32, i32, i32) {
    %c0_i32 = arith.constant 0 : i32
    %c0_i32_0 = arith.constant 0 : i32
    %c0_i32_1 = arith.constant 0 : i32
    %c0_i32_2 = arith.constant 0 : i32
    return %c0_i32, %c0_i32_0, %c0_i32_1 : i32, i32, i32
  }
  func.func @transform_10(%arg0: i32, %arg1: i32, %arg2: i32) -> (i32, i32, i32) {
    %c0_i32 = arith.constant 0 : i32
    %c0_i32_0 = arith.constant 0 : i32
    %c0_i32_1 = arith.constant 0 : i32
    %c0_i32_2 = arith.constant 0 : i32
    return %c0_i32, %c0_i32_0, %c0_i32_1 : i32, i32, i32
  }
  func.func @transform_11(%arg0: i32, %arg1: i32, %arg2: i32) -> (i32, i32) {
    %c0_i32 = arith.constant 0 : i32
    %c0_i32_0 = arith.constant 0 : i32
    return %c0_i32, %arg2 : i32, i32
  }
  func.func @transform_12(%arg0: i32, %arg1: i32, %arg2: i32) -> (i32, i32) {
    %c0_i32 = arith.constant 0 : i32
    %c0_i32_0 = arith.constant 0 : i32
    return %c0_i32, %arg2 : i32, i32
  }
  func.func @transform_13(%arg0: i32, %arg1: i32, %arg2: i32) -> (i32, i32) {
    %c0_i32 = arith.constant 0 : i32
    %c0_i32_0 = arith.constant 0 : i32
    return %arg2, %c0_i32 : i32, i32
  }
  func.func @transform_14(%arg0: i32, %arg1: i32, %arg2: i32) -> (i32, i32) {
    %c0_i32 = arith.constant 0 : i32
    %c0_i32_0 = arith.constant 0 : i32
    %c0_i32_1 = arith.constant 0 : i32
    return %c0_i32, %c0_i32_0 : i32, i32
  }
  func.func @transform_15(%arg0: i32, %arg1: i32, %arg2: i32) -> (i32, i32, i32) {
    %c0_i32 = arith.constant 0 : i32
    %c0_i32_0 = arith.constant 0 : i32
    return %arg0, %arg1, %c0_i32 : i32, i32, i32
  }
}

</mosaic_0001>

<bundles_post_ra>
// kernel: tpu_custom_call.1
= control target key start
LH: loop header
LB: loop body
LE: loop exit
PB: predicated region body
PF: predicated region fallthrough
CT: control target
= control target key end

     0   :  { %s3746_s0 = inlined_call_operand.vmem [shape: f32[2,8,32], index: 0, kind: input, shape index: {}]   ;;  %s3747_s1 = inlined_call_operand.hbm [shape: bf16[2,8,32], index: 1, kind: input, shape index: {}]   ;;  %s3748_s2 = inlined_call_operand.vmem [shape: f32[2,1,8], index: 2, kind: input, shape index: {}]   ;;  %s3749_s3 = inlined_call_operand.vmem [shape: bf16[32,32], index: 3, kind: input, shape index: {}]   ;;  %s3750_s4 = inlined_call_operand.vmem [shape: bf16[32,64], index: 4, kind: input, shape index: {}]   ;;  %s3751_s5 = inlined_call_operand.hbm [shape: bf16[32,32], index: 5, kind: input, shape index: {}]   ;;  %s3752_s6 = inlined_call_operand.hbm [shape: f32[1,32], index: 6, kind: input, shape index: {}]   ;;  %s3753_s7 = inlined_call_operand.hbm [shape: f32[1,64], index: 7, kind: input, shape index: {}]   ;;  %s3754_s8 = inlined_call_operand.hbm [shape: f32[1,32], index: 8, kind: input, shape index: {}]   ;;  %s3755_s9 = inlined_call_operand.hbm [shape: f32[2,1,32], index: 9, kind: input, shape index: {}]   ;;  %s3756_s10 = inlined_call_operand.vmem [shape: f32[2,1,32], index: 10, kind: input, shape index: {}]   ;;  %s3757_s11 = inlined_call_operand.vmem [shape: bf16[32,64], index: 11, kind: input, shape index: {}]   ;;  %s3758_s12 = inlined_call_operand.vmem [shape: f32[1,64], index: 12, kind: input, shape index: {}]   ;;  %s3759_s13 = inlined_call_operand.vmem [shape: bf16[64,32], index: 13, kind: input, shape index: {}]   ;;  %s3760_s14 = inlined_call_operand.vmem [shape: f32[1,32], index: 14, kind: input, shape index: {}]   ;;  %s3761_s15 = inlined_call_operand.hbm [shape: f32[2,8,32], index: 15, kind: output, shape index: {}]  }
   0x1   :  { %3773 = sst [smem:[#allocation23_spill]] %s3746_s0 }
   0x2   :  { %3774 = sst [smem:[#allocation24_spill]] %s3748_s2 }
   0x3   :  { %3775 = sst [smem:[#allocation25_spill]] %s3749_s3 }
   0x4   :  { %3776 = sst [smem:[#allocation26_spill]] %s3750_s4 }
   0x5   :  { %3777 = sst [smem:[#allocation27_spill]] %s3751_s5 }
   0x6   :  { %3778 = sst [smem:[#allocation28_spill]] %s3756_s10 }
   0x7   :  { %3779 = sst [smem:[#allocation29_spill]] %s3757_s11 }
   0x8   :  { %3780 = sst [smem:[#allocation30_spill]] %s3758_s12 }
   0x9   :  { %3781 = sst [smem:[#allocation31_spill]] %s3759_s13 }
   0xa   :  { %3782 = sst [smem:[#allocation32_spill]] %s3760_s14 }
   0xb   :  { %3783 = sst [smem:[#allocation33_spill]] %s3761_s15 }
   0xc   :  { %20 = vsyncpa [#allocation7], 0 }
   0xd   :  { %22 = vsyncpa [#allocation7 + $0x1], 0 }
   0xe   :  { %23 = vsyncpa [#allocation10], 0 }
   0xf   :  { %24 = vsyncpa [#allocation13], 0 }
  0x10   :  { %25 = vsyncpa [#allocation16], 0 }
  0x11   :  { %26 = vsyncpa [#allocation8], 0 }
  0x12   :  { %28 = vsyncpa [#allocation8 + $0x1], 0  ;;  %s3147_s18 = smov 0   ;;  %s3149_s19 = smov 0  }
  0x13   :  { %s3151_s20 = smov 0   ;;  %s3153_s21 = smov 0  }
  0x14   :  { %s3155_s22 = smov 0   ;;  %s3157_s23 = smov 0  }
  0x15 LB: > { %s3762_s24 = sadd.s32 4294967295, %s3042_s23   ;;  %p2414_p0 = scmp.ge.s32.totalorder %s3042_s23, 1  ;;  %s3042_s23 = sphi %s3157_s23, %s34_s23   ;;  %s3038_s22 = sphi %s3155_s22, %s3815_s22   ;;  %s3034_s21 = sphi %s3153_s21, %s3814_s21   ;;  %s3030_s20 = sphi %s3151_s20, %s3813_s20   ;;  %s3026_s19 = sphi %s3149_s19, %s3812_s19   ;;  %s3022_s18 = sphi %s3147_s18, %s3811_s18  }
  0x16   : > { %p3181_p1 = scmp.eq.s32.totalorder %s3762_s24, 0  ;;  %p433_p2 = scmp.lt.s32.totalorder %s3042_s23, 3 }
  0x17   : > { %s3044_s27 = smov [#allocation9]   ;;  %s3045_s30 = smov [#allocation12]  }
  0x18   : > { %s3784_s25 = scalar_select %p3181_p1, 1, 0 }
  0x19   : > { %p3186_p3 = pnand %p2414_p0, %p433_p2  ;;  %s451_s28 = sshll.u32 %s3044_s27, 4  ;;  %s3190_s28 = int_to_ptr.vmem [resolvable:$true] %s451_s28 }
  0x1a   : > { %s476_s16 = sshll.u32 %s3045_s30, 4  ;;  %s3046_s17 = smov [#allocation11]   ;;  %s3201_s16 = int_to_ptr.vmem [resolvable:$true] %s476_s16 }
  0x1b   : > { %s3785_s26 = scalar_select %p3186_p3, 1, 0 }
  0x1c   : > { %p2637_p4 = pneg %p3186_p3  ;;  %s3203_s24 = sshll.u32 %s3046_s17, 4  ;;  %s466_s24 = int_to_ptr.vmem [resolvable:$true] %s3203_s24 }
  0x1d   : > { %s3787_s5 = sld [smem:[#allocation27_spill]] }
  0x1e   : > { %p3197_p6 = pnand %p2637_p4, %p3181_p1 }
  0x20   : > { %p3213_p8 = pneg %p3197_p6 }
  0x23   : > { %s2778_s12 = scalar_lea.hbm %s3787_s5, 256 }
  0x24   : > { %p2779_p7 = scmp.ne.s32.totalorder %s3787_s5, %s2778_s12  ;;  %p2785_p11 = scmp.lt.u32.totalorder %s2778_s12, %s3787_s5 }
  0x26   : > { %p2781_p9 = pnand %p3213_p8, %p2779_p7 }
  0x28   : > { %p2782_p10 = pneg %p2781_p9 }
  0x2a   : > { %p2787_p12 = pnand %p2785_p11, %p2782_p10 }
  0x2c   : > { %2790 = shalt.err (!%p2787_p12)
}
  0x2d   : > { %s2791_s11 = scalar_lea.vmem %s3190_s28, 256  ;;  %p2799_p4 = scmp.lt.s32.totalorder %s3190_s28, %s3190_s28 }
  0x2e   : > { %p2792_p13 = scmp.ne.s32.totalorder %s3190_s28, %s2791_s11  ;;  %p2800_p5 = scmp.lt.s32.totalorder %s2791_s11, %s2791_s11 }
  0x30   : > { %p2794_p0 = pnand %p2792_p13, %p3213_p8  ;;  %p2801_p7 = por %p2800_p5, %p2799_p4 }
  0x32   : > { %p2795_p2 = pneg %p2794_p0 }
  0x34   : > { %p2802_p9 = pnand %p2801_p7, %p2795_p2 }
  0x36   : > { %2805 = shalt.err (!%p2802_p9)
}
  0x37   : > { %s3047_s13 = smov 64   ;;  %s3048_s12 = smov 4  }
  0x38   : > { %2640 = dma.hbm_to_vmem [thread:$0]  (!%p3197_p6), %s3787_s5, 256, %s3190_s28, [#allocation10], %s3047_s13, %s3047_s13, %s3048_s12  }
  0x39   : > { %s2806_s2 = scalar_lea.hbm %s3753_s7, 16 }
  0x3a   : > { %p2807_p5 = scmp.ne.s32.totalorder %s3753_s7, %s2806_s2  ;;  %p2813_p12 = scmp.lt.u32.totalorder %s2806_s2, %s3753_s7 }
  0x3c   : > { %p2809_p10 = pnand %p2807_p5, %p3213_p8 }
  0x3e   : > { %p2810_p11 = pneg %p2809_p10 }
  0x40   : > { %p2815_p13 = pnand %p2813_p12, %p2810_p11 }
  0x42   : > { %2818 = shalt.err (!%p2815_p13)
}
  0x43   : > { %s2819_s28 = scalar_lea.vmem %s3201_s16, 16  ;;  %s2826_s3 = scalar_lea.vmem %s3201_s16, 32 }
  0x44   : > { %p2820_p0 = scmp.ne.s32.totalorder %s3201_s16, %s2819_s28  ;;  %p2827_p7 = scmp.lt.s32.totalorder %s3201_s16, %s3201_s16 }
  0x45   : > { %p2828_p9 = scmp.lt.s32.totalorder %s2826_s3, %s2819_s28 }
  0x46   : > { %p2822_p2 = pnand %p2820_p0, %p3213_p8 }
  0x47   : > { %p2829_p5 = por %p2828_p9, %p2827_p7 }
  0x48   : > { %p2823_p4 = pneg %p2822_p2 }
  0x4a   : > { %p2830_p10 = pnand %p2829_p5, %p2823_p4 }
  0x4c   : > { %2833 = shalt.err (!%p2830_p10)
}
  0x4d   : > { %2646 = dma.hbm_to_vmem [thread:$0]  (!%p3197_p6), %s3753_s7, 16, %s3201_s16, [#allocation13]  }
  0x4e   : > { %s2834_s12 = scalar_lea.hbm %s3752_s6, 16 }
  0x4f   : > { %p2835_p11 = scmp.ne.s32.totalorder %s3752_s6, %s2834_s12  ;;  %p2841_p0 = scmp.lt.u32.totalorder %s2834_s12, %s3752_s6 }
  0x51   : > { %p2837_p12 = pnand %p2835_p11, %p3213_p8 }
  0x53   : > { %p2838_p13 = pneg %p2837_p12 }
  0x55   : > { %p2843_p2 = pnand %p2841_p0, %p2838_p13 }
  0x57   : > { %2846 = shalt.err (!%p2843_p2)
}
  0x58   : > { %s2847_s11 = scalar_lea.vmem %s466_s24, 16  ;;  %s2854_s16 = scalar_lea.vmem %s466_s24, 32 }
  0x59   : > { %p2848_p4 = scmp.ne.s32.totalorder %s466_s24, %s2847_s11  ;;  %p2855_p5 = scmp.lt.s32.totalorder %s466_s24, %s466_s24 }
  0x5a   : > { %p2856_p10 = scmp.lt.s32.totalorder %s2854_s16, %s2847_s11 }
  0x5b   : > { %p2850_p7 = pnand %p2848_p4, %p3213_p8 }
  0x5c   : > { %p2857_p3 = por %p2856_p10, %p2855_p5 }
  0x5d   : > { %p2851_p9 = pneg %p2850_p7 }
  0x5f   : > { %p2858_p1 = pnand %p2857_p3, %p2851_p9 }
  0x61   : > { %2861 = shalt.err (!%p2858_p1)
}
  0x62   : > { %2643 = dma.hbm_to_vmem [thread:$0]  (!%p3197_p6), %s3752_s6, 16, %s466_s24, [#allocation10]  }
  0x63   : > { %s3049_s2 = smov [#allocation14]   ;;  %s3050_s10 = smov [#allocation15]  }
  0x64   : > { %s487_s4 = sshll.u32 %s3049_s2, 4  ;;  %s497_s13 = sshll.u32 %s3050_s10, 4  ;;  %s488_s4 = int_to_ptr.vmem [resolvable:$true] %s487_s4  ;;  %s498_s13 = int_to_ptr.vmem [resolvable:$true] %s497_s13 }
  0x65   : > { %s2862_s27 = scalar_lea.hbm %s3754_s8, 16 }
  0x66   : > { %p2863_p1 = scmp.ne.s32.totalorder %s3754_s8, %s2862_s27  ;;  %p2869_p12 = scmp.lt.u32.totalorder %s2862_s27, %s3754_s8 }
  0x68   : > { %p2865_p3 = pnand %p2863_p1, %p3213_p8 }
  0x6a   : > { %p2866_p11 = pneg %p2865_p3 }
  0x6c   : > { %p2871_p13 = pnand %p2869_p12, %p2866_p11 }
  0x6e   : > { %2874 = shalt.err (!%p2871_p13)
}
  0x6f   : > { %s2875_s24 = scalar_lea.vmem %s488_s4, 16  ;;  %s2882_s28 = scalar_lea.vmem %s488_s4, 32 }
  0x70   : > { %p2876_p0 = scmp.ne.s32.totalorder %s488_s4, %s2875_s24  ;;  %p2883_p7 = scmp.lt.s32.totalorder %s488_s4, %s488_s4 }
  0x71   : > { %p2884_p9 = scmp.lt.s32.totalorder %s2882_s28, %s2875_s24 }
  0x72   : > { %p2878_p2 = pnand %p2876_p0, %p3213_p8 }
  0x73   : > { %p2885_p5 = por %p2884_p9, %p2883_p7 }
  0x74   : > { %p2879_p4 = pneg %p2878_p2 }
  0x76   : > { %p2886_p10 = pnand %p2885_p5, %p2879_p4 }
  0x78   : > { %2889 = shalt.err (!%p2886_p10)
}
  0x79   : > { %2649 = dma.hbm_to_vmem [thread:$0]  (!%p3197_p6), %s3754_s8, 16, %s488_s4, [#allocation13]  }
  0x7a   : > { %s2890_s15 = scalar_lea.hbm %s3755_s9, 32 }
  0x7b   : > { %p2891_p1 = scmp.ne.s32.totalorder %s3755_s9, %s2890_s15  ;;  %p2897_p12 = scmp.lt.u32.totalorder %s2890_s15, %s3755_s9 }
  0x7d   : > { %p2893_p3 = pnand %p2891_p1, %p3213_p8 }
  0x7f   : > { %p2894_p11 = pneg %p2893_p3 }
  0x81   : > { %p2899_p13 = pnand %p2897_p12, %p2894_p11 }
  0x83   : > { %2902 = shalt.err (!%p2899_p13)
}
  0x84   : > { %s2903_s16 = scalar_lea.vmem %s498_s13, 32  ;;  %p2911_p7 = scmp.lt.s32.totalorder %s498_s13, %s498_s13 }
  0x85   : > { %p2904_p0 = scmp.ne.s32.totalorder %s498_s13, %s2903_s16  ;;  %p2912_p9 = scmp.lt.s32.totalorder %s2903_s16, %s2903_s16 }
  0x87   : > { %p2906_p2 = pnand %p2904_p0, %p3213_p8  ;;  %p2913_p5 = por %p2912_p9, %p2911_p7 }
  0x89   : > { %p2907_p4 = pneg %p2906_p2 }
  0x8b   : > { %p2914_p10 = pnand %p2913_p5, %p2907_p4 }
  0x8d   : > { %2917 = shalt.err (!%p2914_p10)
}
  0x8e   : > { %s3051_s4 = smov 16   ;;  %s3052_s14 = smov 1  }
  0x8f   : > { %2652 = dma.hbm_to_vmem [thread:$0]  (!%p3197_p6), %s3755_s9, 32, %s498_s13, [#allocation16], %s3051_s4, %s3051_s4, %s3052_s14  }
  0x90   : > { %s2413_s3 = sadd.s32 4294967294, %s3042_s23   ;;  %s53_s2 = sadd.s32 1, %s3038_s22 }
  0x91   : > { %s88_s10 = sadd.s32 1, %s3030_s20  ;;  %p55_p8 = scmp.ge.s32.totalorder %s53_s2, 2 }
  0x92   : > { %p95_p1 = scmp.ne.s32.totalorder %s3030_s20, %s3026_s19  ;;  %p96_p3 = scmp.eq.s32.totalorder %s3042_s23, 0 }
  0x93   : > { %p101_p11 = scmp.ne.s32.totalorder %s3026_s19, %s3022_s18  ;;  %s3817_s2 = smov (%p55_p8, %s53_s2), 0 }
  0x94   : > { %p3323_p12 = por %p96_p3, %p95_p1  ;;  %p3790_p13 = scmp.ne.s32.totalorder %s3784_s25, 0 }
  0x95   : > { %s85_s12 = ssub.s32 %s3038_s22, %s3817_s2  ;;  %s3792_s15 = sadd.s32 4294967295, %s3042_s23  }
  0x96   : > { %p3329_p6 = por %p3790_p13, %p101_p11  ;;  %p420_p0 = scmp.eq.s32.totalorder %s3792_s15, 1 }
  0x97   : > { %p86_p2 = scmp.eq.s32.totalorder %s85_s12, 0  ;;  %p426_p4 = scmp.eq.s32.totalorder %s2413_s3, 1 }
  0x98   : > { %p3337_p7 = por %p420_p0, %p95_p1  ;;  %p2666_p9 = scmp.lt.s32.totalorder %s3042_s23, 2 }
  0x99   : > { %s3343_s30 = scalar_select %p86_p2, %s3030_s20, %s88_s10  }
  0x9a   : > { %s3793_s27 = scalar_select %p3337_p7, 1, 0 }
  0x9b   : > { %p3345_p5 = por %p426_p4, %p101_p11  ;;  %s549_s11 = sand.u32 1, %s3030_s20  }
  0x9c   : > { %s2424_s16 = sshll.u32 %s549_s11, 2  ;;  %s2425_s4 = sshll.u32 %s3038_s22, 6 }
  0x9d   : > { %s3794_s17 = scalar_select %p3345_p5, 1, 0 }
  0x9e   : > { %s3354_s28 = scalar_lea.hbm %s3747_s1, %s2425_s4  ;;  %s553_s3 = scalar_lea.vmem [#allocation6], %s2424_s16 }
  0x9f   : > { %s560_s12 = sshll.u32 %s553_s3, 4  ;;  %p3360_p10 = pnand %p2666_p9, %p3323_p12  ;;  %s3356_s12 = int_to_ptr.vmem [resolvable:$true] %s560_s12 }
  0xa0   : > { %s550_s15 = scalar_lea.sflag [#allocation7], %s549_s11  ;;  %s2918_s5 = scalar_lea.hbm %s3354_s28, 64 }
  0xa1   : > { %p2919_p8 = scmp.ne.s32.totalorder %s3354_s28, %s2918_s5  ;;  %p2920_p1 = pneg %p3360_p10 }
  0xa2   : > { %s2923_s14 = scalar_lea.hbm %s3747_s1, 128  ;;  %p2924_p12 = scmp.lt.u32.totalorder %s3354_s28, %s3747_s1 }
  0xa3   : > { %p2921_p3 = pnand %p2920_p1, %p2919_p8  ;;  %p2925_p13 = scmp.lt.u32.totalorder %s2923_s14, %s2918_s5 }
  0xa4   : > { %p2927_p2 = scmp.lt.u32.totalorder %s2918_s5, %s3354_s28 }
  0xa5   : > { %p2922_p11 = pneg %p2921_p3  ;;  %p2926_p0 = por %p2925_p13, %p2924_p12 }
  0xa7   : > { %p2928_p4 = por %p2927_p2, %p2926_p0 }
  0xa9   : > { %p2929_p9 = pnand %p2928_p4, %p2922_p11 }
  0xab   : > { %2932 = shalt.err (!%p2929_p9)
}
  0xac   : > { %s2933_s11 = scalar_lea.vmem %s3356_s12, 64  ;;  %s3053_s3 = smov [#allocation6]  }
  0xad   : > { %p2934_p8 = scmp.ne.s32.totalorder %s3356_s12, %s2933_s11  ;;  %s2938_s16 = sshll.u32 %s3053_s3, 4  ;;  %s2939_s16 = int_to_ptr.vmem [resolvable:$false] %s2938_s16 }
  0xae   : > { %s2940_s4 = scalar_lea.vmem %s2939_s16, 128  ;;  %p2941_p7 = scmp.lt.s32.totalorder %s3356_s12, %s2939_s16 }
  0xaf   : > { %p2936_p3 = pnand %p2934_p8, %p2920_p1  ;;  %p2942_p12 = scmp.lt.s32.totalorder %s2940_s4, %s2933_s11 }
  0xb1   : > { %p2937_p5 = pneg %p2936_p3  ;;  %p2943_p13 = por %p2942_p12, %p2941_p7 }
  0xb3   : > { %p2944_p0 = pnand %p2943_p13, %p2937_p5 }
  0xb5   : > { %2947 = shalt.err (!%p2944_p0)
}
  0xb6   : > { %2656 = dma.hbm_to_vmem [thread:$0]  (!%p3360_p10), %s3354_s28, 64, %s3356_s12, %s550_s15  }
  0xb7   : > { %p3796_p11 = scmp.ne.s32.totalorder %s3785_s26, 0 }
  0xb8   : > { %s3392_s5 = sand.u32 (!%p3796_p11), 1, %s3026_s19  }
  0xb9   : > { %575 = sbr.rel (%p3796_p11) target bundleno = 2795 (0xaeb), region = 80  ;;  %s2427_s14 = sshll.u32 (!%p3796_p11), %s3392_s5, 2 }
  0xba   : > { %s578_s29 = scalar_lea.sflag (!%p3796_p11), [#allocation7], %s3392_s5  ;;  %s581_s24 = scalar_lea.vmem (!%p3796_p11), [#allocation6], %s2427_s14 }
  0xc0   : > { %3001 = dma.done.wait (%p3329_p6), %s578_s29, 64  }
  0xc1   : > { %3003 = vsyncadd (%p3329_p6), %s578_s29, 4294967232  ;;  %p3797_p7 = scmp.ne.s32.totalorder %s3784_s25, 0 }
  0xc3   : > { %3005 = dma.done.wait (%p3797_p7), [#allocation10], 272  }
  0xc4   : > { %3007 = vsyncadd (%p3797_p7), [#allocation10], 4294967024 }
  0xc5   : > { %3009 = dma.done.wait (%p3797_p7), [#allocation13], 32  }
  0xc6   : > { %3011 = vsyncadd (%p3797_p7), [#allocation13], 4294967264 }
  0xc7   : > { %3013 = dma.done.wait (%p3797_p7), [#allocation16], 32  }
  0xc8   : > { %3015 = vsyncadd (%p3797_p7), [#allocation16], 4294967264  ;;  %p670_p6 = scmp.lt.s32.totalorder %s3034_s21, 1  ;;  %s3798_s0 = sld [smem:[#allocation23_spill]]  ;;  %vm724_vm0 = vcmask 261120   ;;  %v3054_v3 = vmov 0.0   ;;  %v783_v36 = vlaneseq }
  0xc9   : > { %s3799_s11 = sld [smem:[#allocation26_spill]]  ;;  %2521 = vmatprep.subr.bf16.mxu1 %v3054_v3  ;;  %vm3055_vm1 = vmmov 0   ;;  %2537 = vmatprep.subr.bf16.mxu0 %v3054_v3  ;;  %v700_v5 = vld [vmem:[%s581_s24] sm:$0xf]  ;;  %s3800_s29 = sld [smem:[#allocation25_spill]]  ;;  %vm1008_vm4 = vcmask 60416  }
  0xca   : > { %s3414_s26 = scalar_select %p670_p6, %s3034_s21, 1  ;;  %2525 = vmatprep.mubr.msk.bf16.mxu1 %vm3055_vm1, %v3054_v3  ;;  %2539 = vmatprep.mubr.msk.bf16.mxu0 %vm3055_vm1, %v3054_v3  ;;  %v2435_v13 = vld [vmem:[#allocation12] ss:$0 sm:$0xff]  ;;  %v2447_v27 = vld [vmem:[#allocation15] ss:$0 sm:$0xff]  ;;  %v3465_v38 = vshrl.u32 %v783_v36, 7 }
  0xcb   : > { %s3056_s28 = smov 120   ;;  %s3057_s12 = smov 104   ;;  %v3059_v34 = vmov 1983009808   ;;  %v3060_v39 = vmov 1934713408  }
  0xcc   : > { %s2434_s13 = sshll.u32 %s3414_s26, 3  ;;  %s3801_s3 = sld [smem:[#allocation28_spill]]  ;;  %v781_v35 = vunpack.c.l.s4 %v3059_v34  ;;  %v813_v40 = vunpack.c.l.s4 %v3060_v39  ;;  %vm1354_vm5 = vcmask 64512   ;;  %vm1594_vm7 = vcmask 1043456  }
  0xcd   : > { %s3802_s14 = sld [smem:[#allocation24_spill]]  ;;  %vm1925_vm8 = vcmask 130048   ;;  %vm1927_vm9 = vcmask 195584   ;;  %vm2045_vm12 = vcmask 257024   ;;  %s3806_s25 = sld [smem:[#allocation30_spill]]  ;;  %vm2150_vm13 = vcmask 523264  }
  0xce   : > { %s676_s10 = scalar_lea.vmem %s3798_s0, %s2434_s13  ;;  %v782_v37 = vunpack.c.0.s8 %v781_v35  ;;  %v814_v46 = vunpack.c.0.s8 %v813_v40  ;;  %s3063_s13 = smov 16  }
  0xcf   : > { %v3420_v0 = vld [vmem:[%s676_s10] sm:$0xff]  ;;  %v2743_v4 = vld [vmem:[%s3799_s11 + $0x8] sm:$0xff]   ;;  %s3058_s10 = smov 112   ;;  %s3803_s15 = sld [smem:[#allocation32_spill]] }
  0xd0   : > { %v1090_v1 = vsel %vm724_vm0, %v3420_v0, 0.0  ;;  %v2742_v2 = vld [vmem:[%s3799_s11] sm:$0xff]   ;;  %v2745_v12 = vld [vmem:[%s3800_s29 + $0x8] sm:$0xff]   ;;  %v3472_v43 = vsub.s32 %v782_v37, %v3465_v38  ;;  %v3487_v52 = vsub.s32 %v814_v46, %v3465_v38  ;;  %s2485_s16 = sshll.u32 %s3034_s21, 7  ;;  %p3808_p10 = scmp.ne.s32.totalorder %s3793_s27, 0 }
  0xd1   : > { %1091 = vadd.xlane.f32.xlu0 %v1090_v1  ;;  %2522 = vmatpush3.bf16.msra.mxu1 %v2742_v2  ;;  %v2744_v11 = vld [vmem:[%s3800_s29] sm:$0xff]   ;;  %s3066_s21 = smov [#allocation17]  }
  0xd2   : > { %2523 = vmatprep.subr.bf16.mxu1 %v3054_v3  ;;  %v2448_v30 = vld [vmem:[%s3801_s3] ss:$0 sm:$0xff] }
  0xd3   : > { %s679_s24 = scalar_lea.vmem %s3802_s14, %s3414_s26  ;;  %s3062_s26 = smov 96  }
  0xd4   : > { %s3804_s14 = sld [smem:[#allocation29_spill]] }
  0xd5   : > { %2524 = vmatpush3.bf16.msra.mxu1 %v2743_v4 }
  0xd6   : > { %2529 = vmatprep.subr.bf16.mxu1 %v3054_v3 }
  0xd8   : > { %2526 = vmatmul.mubr.msk.bf16.vlgmr.msra.gmra.mrb[0].mxu1 %vm724_vm0, %v700_v5 }
  0xd9   : > { %2533 = vmatprep.mubr.msk.bf16.mxu1 %vm3055_vm1, %v3054_v3  ;;  %2530 = vmatpush3.bf16.msra.mxu1 %v2744_v11 }
  0xda   : > { %2531 = vmatprep.subr.bf16.mxu1 %v3054_v3 }
  0xdd   : > { %2532 = vmatpush3.bf16.msra.mxu1 %v2745_v12 }
  0xde   : > { %2543 = vmatprep.subr.bf16.mxu1 %v3054_v3 }
 0x15e   : > { %v1092_v6 = vpop.xlane.xlu0 %1091 }
 0x15f   : > { %v1094_v7 = vmul.f32 0.03125, %v1092_v6 }
 0x161   : > { %v1095_v8 = vsub.f32 %v3420_v0, %v1094_v7 }
 0x163   : > { %v1096_v9 = vmul.f32 %v1095_v8, %v1095_v8  ;;  %v1114_v28 = vmul.f32 %v2447_v27, %v1095_v8 }
 0x165   : > { %v1097_v10 = vsel %vm724_vm0, %v1096_v9, 0.0 }
 0x166   : > { %1098 = vadd.xlane.f32.xlu0 %v1097_v10 }
 0x1ab   : > { %v762_v14 = vpop.f32.mrb[0].mxu1 }
 0x1ac   : > { %v3451_v15 = vadd.f32 %v2435_v13, %v762_v14  ;;  %v2527_v16 = vpop.f32.mrb[1].mxu1 }
 0x1ad   : > { %v765_v17 = vpop.f32.mrb[2].mxu1 }
 0x1ae   : > { %769 = vrot.lane.b32.xlu1 %v3451_v15, %s3056_s28  ;;  %775 = vrot.lane.b32.xlu0 %v3451_v15, %s3057_s12  ;;  %v2528_v18 = vpop.f32.mrb[3].mxu1 }
 0x1af   : > { %v3061_v18 = vmov 0  }
 0x1b2   : > { %772 = vrot.lane.b32.xlu1 %v3451_v15, %s3058_s10 }
 0x1f3   : > { %v1099_v19 = vpop.xlane.xlu0 %1098 }
 0x1f4   : > { %v1100_v20 = vmul.f32 0.032258064, %v1099_v19 }
 0x1f6   : > { %2754 = vrsqrt.f32 %v1100_v20  ;;  %vm1103_vm2 = vcmp.eq.f32.partialorder %v1100_v20, inf  ;;  %v1106_v23 = vand.u32 2147483648, %v1100_v20  ;;  %vm1105_vm3 = vcmp.eq.f32.partialorder %v1100_v20, 0.0 }
 0x200   : > { %v2755_v21 = vpop.eup %2754 }
 0x201   : > { %v1102_v22 = vmul.f32 %v2755_v21, %v1100_v20 }
 0x203   : > { %v1104_v24 = vsel %vm1103_vm2, %v1100_v20, %v1102_v22 }
 0x204   : > { %v1107_v25 = vsel %vm1105_vm3, %v1106_v23, %v1104_v24 }
 0x205   : > { %v1115_v26 = vadd.f32 1e-06, %v1107_v25 }
 0x207   : > { %2756 = vrcp.f32 %v1115_v26 }
 0x211   : > { %v2757_v29 = vpop.eup %2756 }
 0x212   : > { %v1117_v31 = vmul.f32 %v2757_v29, %v1114_v28 }
 0x214   : > { %v1124_v32 = vadd.f32 %v2448_v30, %v1117_v31 }
 0x216   : > { %v1125_v33 = vpack.c.bf16 %v1124_v32, %v1124_v32 }
 0x218   : > { %2534 = vmatmul.mubr.msk.bf16.vlgmr.msra.gmra.mrb[4].mxu1 %vm724_vm0, %v1125_v33  ;;  %v2449_v33 = vld [vmem:[#allocation11] ss:$0 sm:$0xff] }
 0x219   : > { %2545 = vmatprep.mubr.msk.bf16.mxu1 %vm3055_vm1, %v3054_v3 }
 0x220   : > { %v3467_v41 = vpop.permute.xlu1 %769  ;;  %v3469_v42 = vpop.permute.xlu0 %775 }
 0x221   : > { %v794_v44 = vcombine.low %v3467_v41, %v3469_v42  ;;  %v795_v45 = vcombine.high %v3467_v41, %v3469_v42 }
 0x223   : > { %v802_v48 = vrot.slane %v794_v44, %v3472_v43  ;;  %v809_v49 = vrot.slane %v795_v45, %v3472_v43 }
 0x224   : > { %v3478_v47 = vpop.permute.xlu1 %772 }
 0x225   : > { %v778_v50 = vcombine.low %v3451_v15, %v3478_v47  ;;  %v779_v51 = vcombine.high %v3451_v15, %v3478_v47 }
 0x227   : > { %v786_v53 = vrot.slane %v778_v50, %v3472_v43  ;;  %v793_v54 = vrot.slane %v779_v51, %v3472_v43 }
 0x229   : > { %v810_v55 = vcombine.low %v786_v53, %v802_v48  ;;  %v811_v56 = vcombine.high %v786_v53, %v802_v48  ;;  %v826_v57 = vcombine.low %v793_v54, %v809_v49  ;;  %v827_v58 = vcombine.high %v793_v54, %v809_v49 }
 0x22b   : > { %v818_v59 = vrot.slane %v810_v55, %v3487_v52  ;;  %v825_v60 = vrot.slane %v811_v56, %v3487_v52  ;;  %v834_v61 = vrot.slane %v826_v57, %v3487_v52  ;;  %v841_v62 = vrot.slane %v827_v58, %v3487_v52 }
 0x22d   : > { %v842_v63 = vcombine.high %v818_v59, %v3054_v3  ;;  %v843_v1 = vcombine.high %v825_v60, %v3054_v3  ;;  %v844_v2 = vcombine.high %v834_v61, %v3054_v3  ;;  %v845_v4 = vcombine.high %v841_v62, %v3054_v3 }
 0x22e   : > { %v2439_v5 = vpack.c.bf16 %v834_v61, %v818_v59  ;;  %v2440_v6 = vpack.c.bf16 %v841_v62, %v825_v60 }
 0x22f   : > { %v2441_v7 = vpack.c.bf16 %v844_v2, %v842_v63  ;;  %v2442_v8 = vpack.c.bf16 %v845_v4, %v843_v1 }
 0x230   : > { %v949_v9 = vrot.slane %v2439_v5, %v3472_v43  ;;  %v957_v10 = vrot.slane %v2440_v6, %v3472_v43 }
 0x231   : > { %v974_v11 = vrot.slane %v2441_v7, %v3472_v43  ;;  %v982_v12 = vrot.slane %v2442_v8, %v3472_v43 }
 0x232   : > { %v958_v13 = vcombine.low %v949_v9, %v957_v10 }
 0x233   : > { %v983_v14 = vcombine.low %v974_v11, %v982_v12 }
 0x234   : > { %v965_v16 = vrot.slane %v958_v13, %v3487_v52 }
 0x235   : > { %v990_v17 = vrot.slane %v983_v14, %v3487_v52 }
 0x236   : > { %v966_v19 = vcombine.high %v965_v16, %v3061_v18  ;;  %v996_v20 = vshrl.u32 %v965_v16, 16 }
 0x237   : > { %v991_v21 = vcombine.high %v990_v17, %v3061_v18  ;;  %v994_v22 = vpack.i.b16 %v990_v17, %v965_v16  ;;  %v997_v23 = vshrl.u32 %v990_v17, 16 }
 0x238   : > { %v1004_v24 = vshrl.u32 %v966_v19, 16 }
 0x239   : > { %v998_v25 = vpack.i.b16 %v997_v23, %v996_v20  ;;  %v1002_v26 = vpack.i.b16 %v991_v21, %v966_v19  ;;  %v1005_v27 = vshrl.u32 %v991_v21, 16  ;;  %1009 = vst.msk [vmem:[#allocation4] sm:$0xf] %vm1008_vm4, %v994_v22 }
 0x23b   : > { %v1006_v28 = vpack.i.b16 %v1005_v27, %v1004_v24  ;;  %1010 = vst.msk [vmem:[#allocation4 + $0x4] sm:$0xf] %vm1008_vm4, %v998_v25  ;;  %1011 = vst.msk [vmem:[#allocation4 + $0x8] sm:$0xf] %vm1008_vm4, %v1002_v26 }
 0x23d   : > { %1012 = vst.msk [vmem:[#allocation4 + $0xc] sm:$0xf] %vm1008_vm4, %v1006_v28 }
 0x240   : > { %v1344_v29 = vld [vmem:[#allocation4] sm:$0xf] }
 0x241   : > { %v1359_v31 = vsel %vm1354_vm5, %v1344_v29, 0 }
 0x242   : > { %v1345_v30 = vld [vmem:[#allocation4 + $0x4] sm:$0xf]  ;;  %2538 = vmatpush3.bf16.xpose.msra.mxu0 %v1359_v31  ;;  %v1346_v21 = vld [vmem:[#allocation4 + $0x8] sm:$0xf] }
 0x243   : > { %v1405_v32 = vsel %vm1354_vm5, %v1345_v30, 0  ;;  %2549 = vmatprep.subr.bf16.mxu0 %v3054_v3  ;;  %v1451_v26 = vsel %vm1354_vm5, %v1346_v21, 0 }
 0x244   : > { %2544 = vmatpush3.bf16.xpose.msra.mxu1 %v1405_v32  ;;  %v1347_v25 = vld [vmem:[#allocation4 + $0xc] sm:$0xf] }
 0x245   : > { %2555 = vmatprep.subr.bf16.mxu1 %v3054_v3  ;;  %v1497_v29 = vsel %vm1354_vm5, %v1347_v25, 0 }
 0x2eb   : > { %v1186_v34 = vpop.f32.mrb[4].mxu1 }
 0x2ec   : > { %v1187_v35 = vadd.f32 %v2449_v33, %v1186_v34  ;;  %v2535_v36 = vpop.f32.mrb[5].mxu1 }
 0x2ed   : > { %v1189_v37 = vpop.f32.mrb[6].mxu1  ;;  %v1351_v36 = vsub.s32 0, %v3465_v38 }
 0x2ee   : > { %v1192_v39 = vmul.f32 0.35355338, %v1187_v35  ;;  %v2536_v40 = vpop.f32.mrb[7].mxu1  ;;  %v1341_v35 = vld [vmem:[%s679_s24] sm:$0x1] }
 0x2ef   : > { %vm1342_vm6 = vcmp.eq.f32.partialorder %v1341_v35, 0.0 }
 0x2f0   : > { %1194 = vrot.lane.b32.xlu1 %v1192_v39, %s3056_s28  ;;  %v1343_v37 = vsel %vm1342_vm6, -1e+09, %v3054_v3  ;;  %s3064_s28 = smov 8  }
 0x2f4   : > { %1197 = vrot.lane.b32.xlu1 %v1192_v39, %s3058_s10 }
 0x2f8   : > { %1200 = vrot.lane.b32.xlu1 %v1192_v39, %s3057_s12  ;;  %s3065_s12 = smov 24  }
 0x362   : > { %v1195_v44 = vpop.permute.xlu1 %1194 }
 0x366   : > { %v1198_v45 = vpop.permute.xlu1 %1197 }
 0x367   : > { %v1203_v46 = vcombine.low %v1192_v39, %v1198_v45  ;;  %v1204_v48 = vcombine.high %v1192_v39, %v1198_v45  ;;  %v1352_v39 = vrot.slane %v1343_v37, %v1351_v36 }
 0x369   : > { %v1211_v53 = vrot.slane %v1203_v46, %v3472_v43  ;;  %v1218_v54 = vrot.slane %v1204_v48, %v3472_v43 }
 0x36a   : > { %v1201_v49 = vpop.permute.xlu1 %1200 }
 0x36b   : > { %v1219_v50 = vcombine.low %v1195_v44, %v1201_v49  ;;  %v1220_v51 = vcombine.high %v1195_v44, %v1201_v49 }
 0x36d   : > { %v1227_v55 = vrot.slane %v1219_v50, %v3472_v43  ;;  %v1234_v56 = vrot.slane %v1220_v51, %v3472_v43 }
 0x36f   : > { %v1235_v57 = vcombine.low %v1211_v53, %v1227_v55  ;;  %v1236_v58 = vcombine.high %v1211_v53, %v1227_v55  ;;  %v1251_v59 = vcombine.low %v1218_v54, %v1234_v56  ;;  %v1252_v60 = vcombine.high %v1218_v54, %v1234_v56 }
 0x371   : > { %v1243_v61 = vrot.slane %v1235_v57, %v3487_v52  ;;  %v1250_v62 = vrot.slane %v1236_v58, %v3487_v52  ;;  %v1259_v63 = vrot.slane %v1251_v59, %v3487_v52  ;;  %v1266_v1 = vrot.slane %v1252_v60, %v3487_v52 }
 0x373   : > { %v1267_v2 = vcombine.high %v1243_v61, %v3054_v3  ;;  %v1268_v4 = vcombine.high %v1250_v62, %v3054_v3  ;;  %v1269_v5 = vcombine.high %v1259_v63, %v3054_v3  ;;  %v1270_v6 = vcombine.high %v1266_v1, %v3054_v3 }
 0x374   : > { %v2453_v7 = vpack.c.bf16 %v1259_v63, %v1243_v61  ;;  %v2454_v8 = vpack.c.bf16 %v1266_v1, %v1250_v62 }
 0x375   : > { %v2455_v9 = vpack.c.bf16 %v1269_v5, %v1267_v2  ;;  %v2456_v10 = vpack.c.bf16 %v1270_v6, %v1268_v4 }
 0x376   : > { %v1286_v11 = vrot.slane %v2453_v7, %v3472_v43  ;;  %v1294_v12 = vrot.slane %v2454_v8, %v3472_v43 }
 0x377   : > { %v1311_v13 = vrot.slane %v2455_v9, %v3472_v43  ;;  %v1319_v14 = vrot.slane %v2456_v10, %v3472_v43 }
 0x378   : > { %v1295_v16 = vcombine.low %v1286_v11, %v1294_v12 }
 0x379   : > { %v1320_v17 = vcombine.low %v1311_v13, %v1319_v14 }
 0x37a   : > { %v1302_v19 = vrot.slane %v1295_v16, %v3487_v52 }
 0x37b   : > { %v1327_v20 = vrot.slane %v1320_v17, %v3487_v52 }
 0x37c   : > { %v1332_v23 = vshrl.u32 %v1302_v19, 16  ;;  %v1303_v30 = vcombine.high %v1302_v19, %v3061_v18 }
 0x37d   : > { %v1331_v22 = vpack.i.b16 %v1327_v20, %v1302_v19  ;;  %v1333_v24 = vshrl.u32 %v1327_v20, 16  ;;  %v1328_v28 = vcombine.high %v1327_v20, %v3061_v18 }
 0x37e   : > { %v1338_v33 = vshrl.u32 %v1303_v30, 16 }
 0x37f   : > { %2540 = vmatmul.mubr.msk.bf16.vlgmr.msra.gmra.mrb[0].mxu0 %vm1354_vm5, %v1331_v22  ;;  %v1334_v27 = vpack.i.b16 %v1333_v24, %v1332_v23  ;;  %v1339_v31 = vshrl.u32 %v1328_v28, 16  ;;  %v1337_v32 = vpack.i.b16 %v1328_v28, %v1303_v30 }
 0x380   : > { %2550 = vmatpush3.bf16.xpose.msra.mxu0 %v1451_v26  ;;  %2551 = vmatprep.mubr.msk.bf16.mxu0 %vm3055_vm1, %v3054_v3 }
 0x381   : > { %2546 = vmatmul.mubr.msk.bf16.vlgmr.msra.gmra.mrb[8].mxu1 %vm1354_vm5, %v1334_v27  ;;  %2561 = vmatprep.subr.bf16.mxu0 %v3054_v3  ;;  %v1340_v34 = vpack.i.b16 %v1339_v31, %v1338_v33 }
 0x382   : > { %2556 = vmatpush3.bf16.xpose.msra.mxu1 %v1497_v29  ;;  %2557 = vmatprep.mubr.msk.bf16.mxu1 %vm3055_vm1, %v3054_v3 }
 0x383   : > { %2567 = vmatprep.subr.bf16.mxu1 %v3054_v3 }
 0x387   : > { %2552 = vmatmul.mubr.msk.bf16.vlgmr.msra.gmra.mrb[4].mxu0 %vm1354_vm5, %v1337_v32 }
 0x388   : > { %2563 = vmatprep.mubr.msk.bf16.mxu0 %vm3055_vm1, %v3054_v3 }
 0x389   : > { %2558 = vmatmul.mubr.msk.bf16.vlgmr.msra.gmra.mrb[12].mxu1 %vm1354_vm5, %v1340_v34 }
 0x38a   : > { %2569 = vmatprep.mubr.msk.bf16.mxu1 %vm3055_vm1, %v3054_v3 }
 0x452   : > { %v1395_v40 = vpop.f32.mrb[0].mxu0 }
 0x453   : > { %v1396_v44 = vadd.f32 %v1395_v40, %v1352_v39  ;;  %v2541_v45 = vpop.f32.mrb[1].mxu0 }
 0x454   : > { %v1398_v46 = vpop.f32.mrb[2].mxu0  ;;  %v1441_v48 = vpop.f32.mrb[8].mxu1 }
 0x455   : > { %v1442_v49 = vadd.f32 %v1441_v48, %v1352_v39  ;;  %v2542_v50 = vpop.f32.mrb[3].mxu0  ;;  %v2547_v51 = vpop.f32.mrb[9].mxu1  ;;  %v1539_v53 = vsel %vm1354_vm5, %v1396_v44, -inf }
 0x456   : > { %1540 = vmax.xlane.f32.xlu1 %v1539_v53  ;;  %v1444_v54 = vpop.f32.mrb[10].mxu1 }
 0x457   : > { %v2548_v55 = vpop.f32.mrb[11].mxu1  ;;  %v1542_v56 = vsel %vm1354_vm5, %v1442_v49, -inf }
 0x458   : > { %1543 = vmax.xlane.f32.xlu0 %v1542_v56 }
 0x45a   : > { %v1487_v38 = vpop.f32.mrb[4].mxu0 }
 0x45b   : > { %v1488_v57 = vadd.f32 %v1487_v38, %v1352_v39  ;;  %v2553_v58 = vpop.f32.mrb[5].mxu0 }
 0x45c   : > { %v1490_v59 = vpop.f32.mrb[6].mxu0  ;;  %v1533_v60 = vpop.f32.mrb[12].mxu1 }
 0x45d   : > { %v1534_v61 = vadd.f32 %v1533_v60, %v1352_v39  ;;  %v2554_v62 = vpop.f32.mrb[7].mxu0  ;;  %v2559_v63 = vpop.f32.mrb[13].mxu1  ;;  %v1545_v1 = vsel %vm1354_vm5, %v1488_v57, -inf }
 0x45e   : > { %1546 = vmax.xlane.f32.xlu1 %v1545_v1  ;;  %v1536_v2 = vpop.f32.mrb[14].mxu1 }
 0x45f   : > { %v2560_v4 = vpop.f32.mrb[15].mxu1  ;;  %v1548_v5 = vsel %vm1354_vm5, %v1534_v61, -inf }
 0x462   : > { %1549 = vmax.xlane.f32.xlu1 %v1548_v5 }
 0x46e   : > { %854 = vrot.lane.b32.xlu0 %v3451_v15, %s3062_s26 }
 0x472   : > { %860 = vrot.lane.b32.xlu0 %v3469_v42, %s3062_s26 }
 0x473   : > { %856 = vrot.lane.b32.xlu1 %v3467_v41, %s3062_s26 }
 0x477   : > { %858 = vrot.lane.b32.xlu1 %v3478_v47, %s3062_s26 }
 0x4e3   : > { %v1541_v6 = vpop.xlane.xlu1 %1540 }
 0x4e4   : > { %v1551_v7 = vsub.f32 %v1396_v44, %v1541_v6 }
 0x4e5   : > { %v1544_v8 = vpop.xlane.xlu0 %1543 }
 0x4e6   : > { %v1555_v9 = vmul.f32 1.442695, %v1551_v7  ;;  %v1552_v10 = vsub.f32 %v1442_v49, %v1544_v8 }
 0x4e8   : > { %2758 = vpow2.f32 %v1555_v9  ;;  %v1557_v11 = vmul.f32 1.442695, %v1552_v10 }
 0x4e9   : > { %v855_v16 = vpop.permute.xlu0 %854 }
 0x4ea   : > { %2760 = vpow2.f32 %v1557_v11 }
 0x4eb   : > { %v1547_v12 = vpop.xlane.xlu1 %1546 }
 0x4ec   : > { %v1553_v13 = vsub.f32 %v1488_v57, %v1547_v12 }
 0x4ed   : > { %v861_v21 = vpop.permute.xlu0 %860 }
 0x4ee   : > { %v1559_v14 = vmul.f32 1.442695, %v1553_v13 }
 0x4ef   : > { %v1550_v17 = vpop.xlane.xlu1 %1549 }
 0x4f0   : > { %2762 = vpow2.f32 %v1559_v14  ;;  %v1554_v15 = vsub.f32 %v1534_v61, %v1550_v17 }
 0x4f2   : > { %v3568_v42 = vpop.eup %2758  ;;  %v1561_v41 = vmul.f32 1.442695, %v1554_v15 }
 0x4f3   : > { %v857_v19 = vpop.permute.xlu1 %856  ;;  %v1563_v47 = vsel %vm1354_vm5, %v3568_v42, 0.0 }
 0x4f4   : > { %v3572_v20 = vpop.eup %2760  ;;  %2764 = vpow2.f32 %v1561_v41  ;;  %1564 = vadd.xlane.f32.xlu1 %v1563_v47  ;;  %v882_v23 = vcombine.low %v857_v19, %v861_v21  ;;  %v883_v24 = vcombine.high %v857_v19, %v861_v21 }
 0x4f5   : > { %v1566_v22 = vsel %vm1354_vm5, %v3572_v20, 0.0 }
 0x4f6   : > { %1567 = vadd.xlane.f32.xlu0 %v1566_v22  ;;  %v890_v29 = vrot.slane %v882_v23, %v3472_v43  ;;  %v897_v30 = vrot.slane %v883_v24, %v3472_v43 }
 0x4f7   : > { %v859_v25 = vpop.permute.xlu1 %858 }
 0x4f8   : > { %v866_v26 = vcombine.low %v855_v16, %v859_v25  ;;  %v867_v27 = vcombine.high %v855_v16, %v859_v25 }
 0x4fa   : > { %v3576_v28 = vpop.eup %2762  ;;  %v874_v31 = vrot.slane %v866_v26, %v3472_v43  ;;  %v881_v32 = vrot.slane %v867_v27, %v3472_v43 }
 0x4fb   : > { %v1569_v33 = vsel %vm1354_vm5, %v3576_v28, 0.0 }
 0x4fc   : > { %v898_v34 = vcombine.low %v874_v31, %v890_v29  ;;  %v899_v35 = vcombine.high %v874_v31, %v890_v29  ;;  %v914_v36 = vcombine.low %v881_v32, %v897_v30  ;;  %v915_v37 = vcombine.high %v881_v32, %v897_v30  ;;  %1570 = vadd.xlane.f32.xlu0 %v1569_v33 }
 0x4fe   : > { %v3584_v39 = vpop.eup %2764  ;;  %v906_v40 = vrot.slane %v898_v34, %v3487_v52  ;;  %v913_v44 = vrot.slane %v899_v35, %v3487_v52  ;;  %v922_v45 = vrot.slane %v914_v36, %v3487_v52  ;;  %v929_v46 = vrot.slane %v915_v37, %v3487_v52  ;;  %v2746_v35 = vld [vmem:[#allocation9] sm:$0xff]  }
 0x4ff   : > { %v1572_v48 = vsel %vm1354_vm5, %v3584_v39, 0.0 }
 0x500   : > { %v930_v49 = vcombine.high %v906_v40, %v3054_v3  ;;  %v931_v50 = vcombine.high %v913_v44, %v3054_v3  ;;  %v932_v51 = vcombine.high %v922_v45, %v3054_v3  ;;  %v933_v53 = vcombine.high %v929_v46, %v3054_v3  ;;  %1573 = vadd.xlane.f32.xlu1 %v1572_v48 }
 0x501   : > { %v2443_v54 = vpack.c.bf16 %v922_v45, %v906_v40  ;;  %v2444_v55 = vpack.c.bf16 %v929_v46, %v913_v44 }
 0x502   : > { %v2445_v56 = vpack.c.bf16 %v932_v51, %v930_v49  ;;  %v2446_v38 = vpack.c.bf16 %v933_v53, %v931_v50 }
 0x503   : > { %v1020_v57 = vrot.slane %v2443_v54, %v3472_v43  ;;  %v1028_v58 = vrot.slane %v2444_v55, %v3472_v43 }
 0x504   : > { %v1045_v59 = vrot.slane %v2445_v56, %v3472_v43  ;;  %v1053_v60 = vrot.slane %v2446_v38, %v3472_v43 }
 0x505   : > { %v1029_v61 = vcombine.low %v1020_v57, %v1028_v58 }
 0x506   : > { %v1054_v62 = vcombine.low %v1045_v59, %v1053_v60 }
 0x507   : > { %v1036_v63 = vrot.slane %v1029_v61, %v3487_v52 }
 0x508   : > { %v1061_v1 = vrot.slane %v1054_v62, %v3487_v52 }
 0x509   : > { %v1037_v2 = vcombine.high %v1036_v63, %v3061_v18  ;;  %v1067_v6 = vshrl.u32 %v1036_v63, 16 }
 0x50a   : > { %v1062_v4 = vcombine.high %v1061_v1, %v3061_v18  ;;  %v1065_v5 = vpack.i.b16 %v1061_v1, %v1036_v63  ;;  %v1068_v7 = vshrl.u32 %v1061_v1, 16 }
 0x50b   : > { %v1075_v10 = vshrl.u32 %v1037_v2, 16 }
 0x50c   : > { %v1069_v8 = vpack.i.b16 %v1068_v7, %v1067_v6  ;;  %v1073_v9 = vpack.i.b16 %v1062_v4, %v1037_v2  ;;  %v1076_v11 = vshrl.u32 %v1062_v4, 16  ;;  %1079 = vst.msk [vmem:[#allocation5] sm:$0xf] %vm1008_vm4, %v1065_v5  ;;  %v2747_v6 = vld [vmem:[#allocation9 + $0x8] sm:$0xff]  }
 0x50e   : > { %v1077_v12 = vpack.i.b16 %v1076_v11, %v1075_v10  ;;  %1080 = vst.msk [vmem:[#allocation5 + $0x4] sm:$0xf] %vm1008_vm4, %v1069_v8  ;;  %1081 = vst.msk [vmem:[#allocation5 + $0x8] sm:$0xf] %vm1008_vm4, %v1073_v9 }
 0x510   : > { %1082 = vst.msk [vmem:[#allocation5 + $0xc] sm:$0xf] %vm1008_vm4, %v1077_v12 }
 0x513   : > { %v1587_v13 = vld [vmem:[#allocation5] sm:$0xf] }
 0x514   : > { %v1596_v18 = vsel %vm1594_vm7, %v1587_v13, 0 }
 0x515   : > { %2562 = vmatpush3.bf16.msra.mxu0 %v1596_v18  ;;  %v1588_v14 = vld [vmem:[#allocation5 + $0x4] sm:$0xf]  ;;  %v1589_v23 = vld [vmem:[#allocation5 + $0x8] sm:$0xf] }
 0x516   : > { %v1642_v16 = vsel %vm1594_vm7, %v1588_v14, 0  ;;  %2573 = vmatprep.subr.bf16.mxu0 %v3054_v3  ;;  %v1688_v27 = vsel %vm1594_vm7, %v1589_v23, 0 }
 0x517   : > { %2568 = vmatpush3.bf16.msra.mxu1 %v1642_v16  ;;  %v1590_v26 = vld [vmem:[#allocation5 + $0xc] sm:$0xf] }
 0x518   : > { %2579 = vmatprep.subr.bf16.mxu1 %v3054_v3 }
 0x581   : > { %v1565_v17 = vpop.xlane.xlu1 %1564 }
 0x582   : > { %2766 = vrcp.f32 %v1565_v17 }
 0x583   : > { %v1568_v15 = vpop.xlane.xlu0 %1567 }
 0x584   : > { %2768 = vrcp.f32 %v1568_v15 }
 0x589   : > { %v1571_v41 = vpop.xlane.xlu0 %1570 }
 0x58a   : > { %2770 = vrcp.f32 %v1571_v41 }
 0x58c   : > { %v2767_v19 = vpop.eup %2766 }
 0x58d   : > { %v1579_v47 = vmul.f32 %v2767_v19, %v3568_v42  ;;  %v1574_v21 = vpop.xlane.xlu1 %1573  ;;  %v1734_v42 = vsel %vm1594_vm7, %v1590_v26, 0 }
 0x58e   : > { %v2769_v22 = vpop.eup %2768  ;;  %2772 = vrcp.f32 %v1574_v21 }
 0x58f   : > { %v1580_v24 = vmul.f32 %v2769_v22, %v3572_v20  ;;  %v1583_v25 = vpack.c.bf16 %v1579_v47, %v1579_v47 }
 0x591   : > { %2564 = vmatmul.mubr.msk.bf16.vlgmr.msra.gmra.mrb[8].mxu0 %vm1354_vm5, %v1583_v25  ;;  %v1584_v29 = vpack.c.bf16 %v1580_v24, %v1580_v24 }
 0x592   : > { %2574 = vmatpush3.bf16.msra.mxu0 %v1688_v27  ;;  %2575 = vmatprep.mubr.msk.bf16.mxu0 %vm3055_vm1, %v3054_v3 }
 0x593   : > { %2570 = vmatmul.mubr.msk.bf16.vlgmr.msra.gmra.mrb[16].mxu1 %vm1354_vm5, %v1584_v29  ;;  %2585 = vmatprep.subr.bf16.mxu0 %v3054_v3 }
 0x594   : > { %v2771_v30 = vpop.eup %2770  ;;  %2580 = vmatpush3.bf16.msra.mxu1 %v1734_v42  ;;  %2581 = vmatprep.mubr.msk.bf16.mxu1 %vm3055_vm1, %v3054_v3 }
 0x595   : > { %v1581_v20 = vmul.f32 %v2771_v30, %v3576_v28  ;;  %2593 = vmatprep.subr.bf16.mxu1 %v3054_v3 }
 0x597   : > { %v1585_v31 = vpack.c.bf16 %v1581_v20, %v1581_v20 }
 0x598   : > { %v2773_v32 = vpop.eup %2772 }
 0x599   : > { %v1582_v33 = vmul.f32 %v2773_v32, %v3584_v39  ;;  %2576 = vmatmul.mubr.msk.bf16.vlgmr.msra.gmra.mrb[12].mxu0 %vm1354_vm5, %v1585_v31 }
 0x59a   : > { %2589 = vmatprep.mubr.msk.bf16.mxu0 %vm3055_vm1, %v3054_v3  ;;  %2586 = vmatpush3.bf16.msra.mxu0 %v2746_v35 }
 0x59b   : > { %v1586_v34 = vpack.c.bf16 %v1582_v33, %v1582_v33  ;;  %2587 = vmatprep.subr.bf16.mxu0 %v3054_v3 }
 0x59d   : > { %2582 = vmatmul.mubr.msk.bf16.vlgmr.msra.gmra.mrb[20].mxu1 %vm1354_vm5, %v1586_v34  ;;  %v2467_v34 = vld [vmem:[#allocation14] ss:$0 sm:$0xff] }
 0x59e   : > { %2597 = vmatprep.mubr.msk.bf16.mxu1 %vm3055_vm1, %v3054_v3  ;;  %2588 = vmatpush3.bf16.msra.mxu0 %v2747_v6 }
 0x59f   : > { %2601 = vmatprep.subr.bf16.mxu0 %v3054_v3 }
 0x664   : > { %v1632_v28 = vpop.f32.mrb[8].mxu0 }
 0x665   : > { %v2565_v36 = vpop.f32.mrb[9].mxu0 }
 0x666   : > { %v1635_v37 = vpop.f32.mrb[10].mxu0  ;;  %v1678_v40 = vpop.f32.mrb[16].mxu1 }
 0x667   : > { %v2566_v39 = vpop.f32.mrb[11].mxu0  ;;  %v2571_v44 = vpop.f32.mrb[17].mxu1  ;;  %v2471_v37 = vld [vmem:[%s3803_s15] ss:$0 sm:$0xff]  ;;  %s2433_s15 = sshll.u32 %s3392_s5, 3 }
 0x668   : > { %v1681_v45 = vpop.f32.mrb[18].mxu1  ;;  %s669_s4 = scalar_lea.vmem [#allocation17], %s2433_s15  ;;  %s2952_s15 = sshll.u32 %s3066_s21, 4  ;;  %s2953_s15 = int_to_ptr.vmem [resolvable:$false] %s2952_s15 }
 0x669   : > { %v2572_v46 = vpop.f32.mrb[19].mxu1  ;;  %s2216_s24 = sshll.u32 %s669_s4, 4  ;;  %s2954_s26 = scalar_lea.vmem %s2953_s15, 256  ;;  %s3698_s24 = int_to_ptr.vmem [resolvable:$true] %s2216_s24 }
 0x66a   : > { %s2948_s0 = scalar_lea.vmem %s3698_s24, 128  ;;  %p2955_p4 = scmp.lt.s32.totalorder %s3698_s24, %s2953_s15 }
 0x66b   : > { %p2949_p5 = scmp.ne.s32.totalorder %s3698_s24, %s2948_s0  ;;  %p2956_p9 = scmp.lt.s32.totalorder %s2954_s26, %s2948_s0 }
 0x66c   : > { %v1724_v48 = vpop.f32.mrb[12].mxu0 }
 0x66d   : > { %v1776_v49 = vcombine.low %v1632_v28, %v1724_v48  ;;  %v1777_v50 = vcombine.high %v1632_v28, %v1724_v48  ;;  %v2577_v51 = vpop.f32.mrb[13].mxu0  ;;  %p2950_p1 = pnand %p2949_p5, %p3808_p10  ;;  %p2957_p8 = por %p2956_p9, %p2955_p4 }
 0x66e   : > { %v1727_v53 = vpop.f32.mrb[14].mxu0 }
 0x66f   : > { %v2578_v54 = vpop.f32.mrb[15].mxu0  ;;  %v1784_v59 = vrot.slane %v1776_v49, %v3472_v43  ;;  %v1791_v60 = vrot.slane %v1777_v50, %v3472_v43  ;;  %p2951_p2 = pneg %p2950_p1 }
 0x670   : > { %v1770_v55 = vpop.f32.mrb[20].mxu1  ;;  %v2748_v54 = vld [vmem:[%s3804_s14] sm:$0xff]  }
 0x671   : > { %v1792_v56 = vcombine.low %v1678_v40, %v1770_v55  ;;  %v1793_v38 = vcombine.high %v1678_v40, %v1770_v55  ;;  %v2583_v57 = vpop.f32.mrb[21].mxu1  ;;  %2594 = vmatpush3.bf16.msra.mxu1 %v2748_v54  ;;  %p2958_p3 = pnand %p2957_p8, %p2951_p2 }
 0x672   : > { %v1773_v58 = vpop.f32.mrb[22].mxu1  ;;  %2595 = vmatprep.subr.bf16.mxu1 %v3054_v3 }
 0x673   : > { %v1800_v61 = vrot.slane %v1792_v56, %v3472_v43  ;;  %v1807_v62 = vrot.slane %v1793_v38, %v3472_v43  ;;  %v2584_v63 = vpop.f32.mrb[23].mxu1 }
 0x675   : > { %v1808_v1 = vcombine.low %v1784_v59, %v1800_v61  ;;  %v1809_v2 = vcombine.high %v1784_v59, %v1800_v61  ;;  %v1824_v4 = vcombine.low %v1791_v60, %v1807_v62  ;;  %v1825_v5 = vcombine.high %v1791_v60, %v1807_v62 }
 0x677   : > { %v1816_v7 = vrot.slane %v1808_v1, %v3487_v52  ;;  %v1823_v8 = vrot.slane %v1809_v2, %v3487_v52  ;;  %v1832_v9 = vrot.slane %v1824_v4, %v3487_v52  ;;  %v1839_v10 = vrot.slane %v1825_v5, %v3487_v52  ;;  %v2473_v1 = vld [vmem:[#allocation15 + $0x1] ss:$0 sm:$0xff]  ;;  %v2474_v5 = vld [vmem:[%s3801_s3 + $0x1] ss:$0 sm:$0xff] }
 0x679   : > { %v1844_v11 = vcombine.low %v1816_v7, %v1823_v8  ;;  %v2465_v12 = vcombine.high %v1816_v7, %v1823_v8  ;;  %v1860_v13 = vcombine.low %v1832_v9, %v1839_v10  ;;  %v2466_v18 = vcombine.high %v1832_v9, %v1839_v10 }
 0x67b   : > { %v1851_v14 = vrot.slane %v1844_v11, %v3472_v43  ;;  %v1859_v16 = vrot.slane %v2465_v12, %v3472_v43  ;;  %v1867_v17 = vrot.slane %v1860_v13, %v3472_v43  ;;  %v1875_v15 = vrot.slane %v2466_v18, %v3472_v43  ;;  %v2475_v12 = vld [vmem:[%s3806_s25] ss:$0 sm:$0xff]  ;;  %s2202_s25 = scalar_lea.sflag [#allocation8], %s3392_s5 }
 0x67d   : > { %v1877_v41 = vcombine.high %v1851_v14, %v1859_v16  ;;  %v1893_v19 = vcombine.high %v1867_v17, %v1875_v15  ;;  %v1876_v47 = vcombine.low %v1851_v14, %v1859_v16  ;;  %v1892_v21 = vcombine.low %v1867_v17, %v1875_v15 }
 0x67f   : > { %v1891_v22 = vrot.slane %v1877_v41, %v3487_v52  ;;  %v1907_v23 = vrot.slane %v1893_v19, %v3487_v52  ;;  %v1884_v24 = vrot.slane %v1876_v47, %v3487_v52  ;;  %v1900_v25 = vrot.slane %v1892_v21, %v3487_v52 }
 0x681   : > { %v1910_v26 = vcombine.low %v1891_v22, %v1907_v23  ;;  %v1909_v27 = vcombine.high %v1884_v24, %v1900_v25  ;;  %v1911_v29 = vcombine.high %v1891_v22, %v1907_v23  ;;  %v1908_v42 = vcombine.low %v1884_v24, %v1900_v25 }
 0x683   : > { %1917 = vrot.lane.b32.xlu1 %v1910_v26, %s3063_s13  ;;  %1913 = vrot.lane.b32.xlu0 %v1909_v27, %s3064_s28  ;;  %s3807_s28 = sld [smem:[#allocation33_spill]] }
 0x687   : > { %1921 = vrot.lane.b32.xlu1 %v1911_v29, %s3065_s12  ;;  %s3805_s12 = sld [smem:[#allocation31_spill]] }
 0x689   : > { %s3696_s10 = scalar_lea.hbm %s3807_s28, %s2485_s16 }
 0x68d   : > { %v2750_v55 = vld [vmem:[%s3805_s12] sm:$0xff]   ;;  %v2751_v56 = vld [vmem:[%s3805_s12 + $0x8] sm:$0xff]   ;;  %v2752_v10 = vld [vmem:[%s3805_s12 + $0x10] sm:$0xff]  }
 0x68e   : > { %v2753_v11 = vld [vmem:[%s3805_s12 + $0x18] sm:$0xff]  }
 0x6f5   : > { %v1918_v43 = vpop.permute.xlu1 %1917  ;;  %v1914_v30 = vpop.permute.xlu0 %1913 }
 0x6f6   : > { %v1924_v20 = vsel %vm1354_vm5, %v1908_v42, %v1914_v30 }
 0x6f7   : > { %v1926_v32 = vsel %vm1925_vm8, %v1924_v20, %v1918_v43 }
 0x6f9   : > { %v1922_v31 = vpop.permute.xlu1 %1921 }
 0x6fa   : > { %v1928_v33 = vsel %vm1927_vm9, %v1926_v32, %v1922_v31 }
 0x6fb   : > { %v1929_v52 = vpack.c.bf16 %v1928_v33, %v1928_v33 }
 0x6fd   : > { %2590 = vmatmul.mubr.msk.bf16.vlgmr.msra.gmra.mrb[16].mxu0 %vm724_vm0, %v1929_v52 }
 0x6fe   : > { %2609 = vmatprep.mubr.msk.bf16.mxu0 %vm3055_vm1, %v3054_v3  ;;  %2602 = vmatpush3.bf16.msra.mxu0 %v2750_v55 }
 0x6ff   : > { %2603 = vmatprep.subr.bf16.mxu0 %v3054_v3 }
 0x702   : > { %2604 = vmatpush3.bf16.msra.mxu0 %v2751_v56 }
 0x703   : > { %2605 = vmatprep.subr.bf16.mxu0 %v3054_v3 }
 0x706   : > { %2606 = vmatpush3.bf16.msra.mxu0 %v2752_v10 }
 0x707   : > { %2607 = vmatprep.subr.bf16.mxu0 %v3054_v3 }
 0x70a   : > { %2608 = vmatpush3.bf16.msra.mxu0 %v2753_v11 }
 0x7d0   : > { %v1990_v35 = vpop.f32.mrb[16].mxu0 }
 0x7d1   : > { %v1991_v28 = vadd.f32 %v2467_v34, %v1990_v35  ;;  %v2591_v36 = vpop.f32.mrb[17].mxu0 }
 0x7d2   : > { %v1993_v40 = vpop.f32.mrb[18].mxu0 }
 0x7d3   : > { %v1996_v39 = vadd.f32 %v1991_v28, %v3420_v0  ;;  %v2592_v44 = vpop.f32.mrb[19].mxu0  ;;  %v2749_v0 = vld [vmem:[%s3804_s14 + $0x8] sm:$0xff]  }
 0x7d4   : > { %2596 = vmatpush3.bf16.msra.mxu1 %v2749_v0 }
 0x7d5   : > { %v2004_v45 = vadd.f32 %v2471_v37, %v1996_v39  ;;  %v2010_v46 = vsel %vm724_vm0, %v1996_v39, 0.0 }
 0x7d6   : > { %2011 = vadd.xlane.f32.xlu0 %v2010_v46 }
 0x7d7   : > { %2005 = vst.msk [vmem:[#allocation2] sm:$0xff] %vm724_vm0, %v2004_v45 }
 0x7de   : > { %v2116_v3 = vld [vmem:[#allocation2] sm:$0xff] }
 0x863   : > { %v2012_v48 = vpop.xlane.xlu0 %2011 }
 0x864   : > { %v2013_v49 = vmul.f32 0.03125, %v2012_v48 }
 0x866   : > { %v2014_v50 = vsub.f32 %v1996_v39, %v2013_v49 }
 0x868   : > { %v2015_v51 = vmul.f32 %v2014_v50, %v2014_v50  ;;  %v2033_v2 = vmul.f32 %v2473_v1, %v2014_v50 }
 0x86a   : > { %v2016_v53 = vsel %vm724_vm0, %v2015_v51, 0.0 }
 0x86b   : > { %2017 = vadd.xlane.f32.xlu1 %v2016_v53 }
 0x8f8   : > { %v2018_v38 = vpop.xlane.xlu1 %2017 }
 0x8f9   : > { %v2019_v57 = vmul.f32 0.032258064, %v2018_v38 }
 0x8fb   : > { %2774 = vrsqrt.f32 %v2019_v57  ;;  %vm2022_vm10 = vcmp.eq.f32.partialorder %v2019_v57, inf  ;;  %v2025_v60 = vand.u32 2147483648, %v2019_v57  ;;  %vm2024_vm11 = vcmp.eq.f32.partialorder %v2019_v57, 0.0 }
 0x905   : > { %v2775_v58 = vpop.eup %2774 }
 0x906   : > { %v2021_v59 = vmul.f32 %v2775_v58, %v2019_v57 }
 0x908   : > { %v2023_v61 = vsel %vm2022_vm10, %v2019_v57, %v2021_v59 }
 0x909   : > { %v2026_v62 = vsel %vm2024_vm11, %v2025_v60, %v2023_v61 }
 0x90a   : > { %v2034_v63 = vadd.f32 1e-06, %v2026_v62 }
 0x90c   : > { %2776 = vrcp.f32 %v2034_v63 }
 0x916   : > { %v2777_v4 = vpop.eup %2776 }
 0x917   : > { %v2036_v6 = vmul.f32 %v2777_v4, %v2033_v2 }
 0x919   : > { %v2043_v7 = vadd.f32 %v2474_v5, %v2036_v6 }
 0x91b   : > { %v2044_v8 = vpack.c.bf16 %v2043_v7, %v2043_v7 }
 0x91d   : > { %2046 = vst.msk [vmem:[#allocation3] sm:$0xf] %vm2045_vm12, %v2044_v8 }
 0x924   : > { %v2047_v9 = vld [vmem:[#allocation3] sm:$0xf] }
 0x925   : > { %2598 = vmatmul.mubr.msk.bf16.vlgmr.msra.gmra.mrb[24].mxu1 %vm724_vm0, %v2047_v9 }
 0x9f8   : > { %v2109_v13 = vpop.f32.mrb[24].mxu1 }
 0x9f9   : > { %v2110_v18 = vadd.f32 %v2475_v12, %v2109_v13  ;;  %v2599_v14 = vpop.f32.mrb[25].mxu1 }
 0x9fa   : > { %v2112_v16 = vpop.f32.mrb[26].mxu1 }
 0x9fb   : > { %v2115_v17 = vmax.f32 %v2110_v18, 0.0  ;;  %v2600_v15 = vpop.f32.mrb[27].mxu1 }
 0x9fd   : > { %v2117_v41 = vpack.c.bf16 %v2115_v17, %v2115_v17 }
 0x9ff   : > { %2610 = vmatmul.mubr.msk.bf16.vlgmr.msra.gmra.mrb[20].mxu0 %vm2150_vm13, %v2117_v41 }
 0xad2   : > { %v2188_v19 = vpop.f32.mrb[20].mxu0 }
 0xad3   : > { %v2194_v47 = vadd.f32 %v2188_v19, %v2116_v3  ;;  %v2611_v21 = vpop.f32.mrb[21].mxu0 }
 0xad4   : > { %v2191_v22 = vpop.f32.mrb[22].mxu0 }
 0xad5   : > { %2195 = vst.msk [vmem:[#allocation2] sm:$0xff] %vm724_vm0, %v2194_v47  ;;  %v2612_v23 = vpop.f32.mrb[23].mxu0 }
 0xadc   : > { %v2199_v24 = vld [vmem:[#allocation2] sm:$0xff] }
 0xadd   : > { %2200 = vst.msk [vmem:[%s669_s4] sm:$0xff] %vm724_vm0, %v2199_v24 }
 0xade   : > { %2961 = shalt.err (!%p2958_p3)
}
 0xadf   : > { %s2962_s5 = scalar_lea.hbm %s3696_s10, 128  ;;  %s2966_s13 = scalar_lea.hbm %s3807_s28, 256 }
 0xae0   : > { %p2963_p12 = scmp.ne.s32.totalorder %s3696_s10, %s2962_s5  ;;  %p2967_p11 = scmp.lt.u32.totalorder %s3696_s10, %s3807_s28 }
 0xae1   : > { %p2968_p7 = scmp.lt.u32.totalorder %s2966_s13, %s2962_s5  ;;  %p2970_p5 = scmp.lt.u32.totalorder %s2962_s5, %s3696_s10 }
 0xae2   : > { %p2964_p13 = pnand %p2963_p12, %p3808_p10 }
 0xae3   : > { %p2969_p6 = por %p2968_p7, %p2967_p11 }
 0xae4   : > { %p2965_p0 = pneg %p2964_p13 }
 0xae5   : > { %p2971_p1 = por %p2970_p5, %p2969_p6 }
 0xae7   : > { %p2972_p2 = pnand %p2971_p1, %p2965_p0 }
 0xae9   : > { %2975 = shalt.err (!%p2972_p2)
}
 0xaea   : > { %2635 = dma.vmem_to_hbm [thread:$0]  (%p3808_p10), %s3698_s24, 128, %s3696_s10, %s2202_s25  }
 0xaeb PF: > { %s2228_s0 = sand.u32 1, %s3022_s18   ;;  %p3809_p4 = scmp.ne.s32.totalorder %s3794_s17, 0 }
 0xaec   : > { %p3810_p9 = scmp.ge.s32.totalorder %s3042_s23, 2  ;;  %s2229_s26 = scalar_lea.sflag [#allocation8], %s2228_s0 }
 0xaee   : > { %p2658_p8 = pnand %p3810_p9, %p3809_p4 }
 0xaf0   : > { %3017 = dma.done.wait (!%p2658_p8), %s2229_s26, 128  }
 0xaf1   : > { %3019 = vsyncadd (!%p2658_p8), %s2229_s26, 4294967168  ;;  %s34_s23 = sadd.s32 1, %s3042_s23   ;;  %s3811_s18 = smov %s3026_s19 }
 0xaf2   : > { %p31_p3 = scmp.ge.s32.totalorder %s34_s23, 4   ;;  %s3812_s19 = smov %s3030_s20 }
 0xaf3   : > { %s3813_s20 = smov %s3343_s30  ;;  %s3814_s21 = smov %s3038_s22 }
 0xaf4   : > { %s3815_s22 = smov %s3817_s2  ;;  %33 = sbr.rel (!%p31_p3) target bundleno = 21 (0x15), region = 174 }
 0xafb   :  { %2234 = vsyncpa [#allocation7], 1 }
 0xafc   :  { %2236 = vsyncpa [#allocation7 + $0x1], 1 }
 0xafd   :  { %2237 = vsyncpa [#allocation10], 1 }
 0xafe   :  { %2238 = vsyncpa [#allocation13], 1 }
 0xaff   :  { %2239 = vsyncpa [#allocation16], 1 }
 0xb00   :  { %2240 = vsyncpa [#allocation8], 1 }
 0xb01   :  { %2242 = vsyncpa [#allocation8 + $0x1], 1 }

</bundles_post_ra>
